<compile_context>
chip_gen: v6e
topology: v6e:2x2x1
jax: 0.10.0
libtpu: 0.0.40
codegen_flags: <defaults>
</compile_context>

<pallas_src>
import jax
import jax.numpy as jnp
from jax import lax
from jax.experimental import pallas as pl
from jax.experimental.pallas import tpu as pltpu


def _leaky_relu(x, slope=0.01):
    return jnp.where(x > 0, x, slope * x)


# ----------------------------- Pallas kernel ---------------------------------
def _mlp_kernel(x_ref, w0_ref, b0_ref, wh_ref, bh_ref, wl_ref, bl_ref, o_ref):
    """Fused 9-layer MLP over one (tm, P*in_dim) tile of lane-packed rows.

    The weight refs arrive with their network-select dim already squeezed, so
    the identical body serves both the actor tiles and the critic tile.
    Matmul inputs are bf16 (MXU-native); accumulation, bias add and LeakyReLU
    stay f32 on the VPU (safe on v5e, exact accumulate everywhere).
    """
    cdt = w0_ref.dtype

    h = jnp.dot(x_ref[...].astype(cdt), w0_ref[...],
                preferred_element_type=jnp.float32)
    h = _leaky_relu(h + b0_ref[...])

    n_hidden = wh_ref.shape[0]

    def body(l, h):
        hl = jnp.dot(h.astype(cdt), wh_ref[l], preferred_element_type=jnp.float32)
        return _leaky_relu(hl + bh_ref[l])

    h = lax.fori_loop(0, n_hidden, body, h, unroll=True)

    h = jnp.dot(h.astype(cdt), wl_ref[...], preferred_element_type=jnp.float32)
    h = _leaky_relu(h + bl_ref[...])
    o_ref[...] = h.astype(o_ref.dtype)


# ------------------------------ helpers ---------------------------------------
def _device_kind():
    try:
        return jax.devices()[0].device_kind.lower()
    except Exception:
        return ""


def _pick_tiling(kind, act_rows, cri_tiles=1):
    """Packed-row tile size + explicit VMEM limit, per TPU generation."""
    if "v7" in kind:                       # 64 MiB VMEM / TC, 2 TCs
        max_rows, vmem_limit = 4096, 32 << 20
    elif "v5" in kind or "v6" in kind:     # 128 MiB VMEM, 1 TC
        max_rows, vmem_limit = 16384, 64 << 20
    else:
        max_rows, vmem_limit = 8192, None
    tm = min(max_rows, max(act_rows, 8))
    tm = ((tm + 7) // 8) * 8
    if "v7" in kind:
        # Keep (actor tiles + critic tile) count even so both TensorCores get
        # equal work under dimension_semantics=("parallel",).
        act_tiles = -(-act_rows // tm)
        if act_tiles > 1 and (act_tiles + cri_tiles) % 2:
            act_tiles += 1
            tm = ((-(-act_rows // act_tiles) + 7) // 8) * 8
    return tm, vmem_limit


def _block_diag(w, p):
    """(a, b) -> (p*a, p*b): p copies of w along the diagonal."""
    if p == 1:
        return w
    a, b = w.shape
    out = jnp.zeros((p * a, p * b), w.dtype)
    for j in range(p):
        out = out.at[j * a:(j + 1) * a, j * b:(j + 1) * b].set(w)
    return out


def _pack_params(params, p, in_dim, compute_dtype):
    """Turn an MLP's params into lane-packed (w0, b0, wh, bh, wl, bl)."""
    (w0, b0), mids, (wl, bl) = params[0], params[1:-1], params[-1]
    if w0.shape[0] < in_dim:               # critic: (2,L) -> (in_dim,L), zero rows
        w0 = jnp.pad(w0, ((0, in_dim - w0.shape[0]), (0, 0)))
    w0p = _block_diag(w0, p).astype(compute_dtype)
    b0p = jnp.tile(b0, (1, p)).astype(jnp.float32)
    whp = jnp.stack([_block_diag(w, p) for w, _ in mids]).astype(compute_dtype)
    bhp = jnp.stack([jnp.tile(b, (1, p)) for _, b in mids]).astype(jnp.float32)
    wlp = _block_diag(wl, p).astype(compute_dtype)
    blp = jnp.tile(bl, (1, p)).astype(jnp.float32)
    return w0p, b0p, whp, bhp, wlp, blp


def _pack_rows(x, p, tm):
    """(n, d) -> ((ceil(n/p) padded to tm), p*d); row r holds tokens r*p..r*p+p-1."""
    n, d = x.shape
    rows = -(-n // p)
    rows_pad = -(-rows // tm) * tm
    x = jnp.pad(x, ((0, rows_pad * p - n), (0, 0)))
    return x.reshape(rows_pad, p * d), rows


# ------------------------------ fused wrapper ---------------------------------
def fused_actor_critic(actor_x, critic_x, actor_params, critic_params,
                       compute_dtype=jnp.bfloat16):
    """One pallas_call running both MLPs (actor over tokens, critic over B rows)."""
    n_act, c = actor_x.shape
    b, c2 = critic_x.shape
    L = actor_params[0][0].shape[1]
    assert len(actor_params) == len(critic_params) >= 3
    for w, _ in list(actor_params[1:-1]) + list(critic_params[1:-1]):
        assert w.shape == (L, L), "all hidden layers must be (L, L)"
    assert actor_params[-1][0].shape == (L, 1)
    assert critic_params[-1][0].shape == (L, 1)
    assert c >= c2

    # Lane packing: P tokens per packed row so the hidden width P*L fills the
    # 128-lane vreg (P = 4 for L = 32).
    p = max(1, 128 // L) if L <= 128 else 1

    # Critic input (B, 2) -> (B, C) so both nets share one packed shape; the
    # matching zero weight rows keep the math identical.
    critic_x = jnp.pad(critic_x, ((0, 0), (0, c - c2)))

    kind = _device_kind()
    tm, vmem_limit = _pick_tiling(kind, -(-n_act // p))

    xa, act_rows = _pack_rows(actor_x.astype(compute_dtype), p, tm)
    xc, cri_rows = _pack_rows(critic_x.astype(compute_dtype), p, tm)
    x = jnp.concatenate([xa, xc], axis=0)
    act_tiles = xa.shape[0] // tm
    total_tiles = x.shape[0] // tm

    packed_a = _pack_params(actor_params, p, c, compute_dtype)
    packed_c = _pack_params(critic_params, p, c, compute_dtype)
    # Leading axis selects the network: 0 = actor, 1 = critic.
    w0, b0, wh, bh, wl, bl = [jnp.stack([a_, c_]) for a_, c_ in zip(packed_a, packed_c)]

    def _wspec(arr):
        nd = arr.ndim

        def idx(i, _nd=nd):
            sel = jnp.where(i < act_tiles, 0, 1)   # actor tiles first, then critic
            return (sel,) + (0,) * (_nd - 1)

        return pl.BlockSpec((None,) + arr.shape[1:], idx)

    out = pl.pallas_call(
        _mlp_kernel,
        out_shape=jax.ShapeDtypeStruct((x.shape[0], p), jnp.float32),
        grid_spec=pltpu.PrefetchScalarGridSpec(
            num_scalar_prefetch=0,
            grid=(total_tiles,),
            in_specs=[
                pl.BlockSpec((tm, x.shape[1]), lambda i: (i, 0)),
                _wspec(w0), _wspec(b0), _wspec(wh),
                _wspec(bh), _wspec(wl), _wspec(bl),
            ],
            out_specs=pl.BlockSpec((tm, p), lambda i: (i, 0)),
        ),
        compiler_params=pltpu.CompilerParams(
            dimension_semantics=("parallel",),
            vmem_limit_bytes=vmem_limit),
    )(x, w0, b0, wh, bh, wl, bl)

    # Unpack: row r / column j of `out` is token r*p + j of that network.
    actor_out = out[:act_rows].reshape(-1)[:n_act]
    crit_start = xa.shape[0]
    critic_out = out[crit_start:crit_start + cri_rows].reshape(-1)[:b]
    return actor_out, critic_out


def _agent_forward_impl(observations, actor_params, critic_params, n_features, dims):
    """Mirror of Agent.forward (dims=2 case)."""
    # NOTE: .squeeze() mirrors the PyTorch module exactly; as in PyTorch it
    # drops the batch dim when B == 1 (known sharp edge of the original).
    obs = jnp.squeeze(observations)                       # (B, C, H, W)
    perm = (0,) + tuple(range(2, obs.ndim)) + (1,)        # -> (B, H, W, C)
    # TODO(synk): the NCHW->NHWC transpose is a full extra pass over the
    # activations; it could be folded into the kernel's in_spec if the caller
    # provided NHWC input directly.
    reshaped = jnp.transpose(obs, perm).reshape(-1, n_features)
    global_in = obs[(slice(None), slice(n_features - 2, n_features)) + (0,) * dims]

    action_flat, critic_flat = fused_actor_critic(
        reshaped, global_in, actor_params, critic_params)

    res = obs.shape[-1]                                   # mirrors PyTorch (assumes H == W)
    action_view = action_flat.reshape((-1,) + (res,) * dims)
    return action_view, critic_flat.reshape(-1, 1)


agent_forward = jax.jit(_agent_forward_impl, static_argnames=("n_features", "dims"))


# ------------------ deterministic parameter init (PyTorch-style) -------------
def init_linear(key, fan_in, fan_out):
    kw, kb = jax.random.split(key)
    bound = 1.0 / (fan_in ** 0.5)
    w = jax.random.uniform(kw, (fan_in, fan_out), jnp.float32, -bound, bound)
    b = jax.random.uniform(kb, (1, fan_out), jnp.float32, -bound, bound)
    return w, b


def init_mlp(key, widths):
    params = []
    for i in range(len(widths) - 1):
        key, sub = jax.random.split(key)
        params.append(init_linear(sub, widths[i], widths[i + 1]))
    return params


# --------------------------- pure-JAX reference -------------------------------
def _mlp_ref(x, params, cast=None):
    h = x
    for w, b in params:
        if cast is not None:                   # mimic bf16 matmul inputs
            h = h.astype(cast).astype(jnp.float32)
            w = w.astype(cast).astype(jnp.float32)
        h = _leaky_relu(h @ w + b)
    return h


def _agent_forward_ref(observations, actor_params, critic_params, n_features,
                       dims=2, cast=None):
    obs = jnp.squeeze(observations)
    perm = (0,) + tuple(range(2, obs.ndim)) + (1,)
    reshaped = jnp.transpose(obs, perm).reshape(-1, n_features)
    action = _mlp_ref(reshaped, actor_params, cast)
    global_in = obs[(slice(None), slice(n_features - 2, n_features)) + (0,) * dims]
    critic = _mlp_ref(global_in, critic_params, cast)
    res = obs.shape[-1]
    return action.reshape((-1,) + (res,) * dims), critic


if __name__ == "__main__":
    B, C, H, W, L = 2, 4, 16, 16, 32          # batch, n_features, spatial, layer_size
    key = jax.random.PRNGKey(0)
    k_obs, k_actor, k_critic = jax.random.split(key, 3)

    obs = jax.random.normal(k_obs, (B, C, H, W), jnp.float32)

    # actor: Linear(C,L) + 7x Linear(L,L) + Linear(L,1), LeakyReLU after each
    actor_params = init_mlp(k_actor, [C] + [L] * 8 + [1])
    # critic: Linear(2,L) + 7x Linear(L,L) + Linear(L,1), LeakyReLU after each
    critic_params = init_mlp(k_critic, [2] + [L] * 8 + [1])

    action, critic = agent_forward(obs, actor_params, critic_params,
                                   n_features=C, dims=2)
    action, critic = jax.block_until_ready((action, critic))

    assert action.shape == (B, W, W), action.shape
    assert critic.shape == (B, 1), critic.shape

    # Tight check vs a reference that mirrors the kernel's bf16 matmul inputs.
    a_bf, c_bf = _agent_forward_ref(obs, actor_params, critic_params,
                                    n_features=C, dims=2, cast=jnp.bfloat16)
    assert jnp.allclose(action, a_bf, atol=2e-3, rtol=2e-2), \
        float(jnp.max(jnp.abs(action - a_bf)))
    assert jnp.allclose(critic, c_bf, atol=2e-3, rtol=2e-2), \
        float(jnp.max(jnp.abs(critic - c_bf)))

    # Loose sanity check vs the full-f32 reference.
    a_f32, c_f32 = _agent_forward_ref(obs, actor_params, critic_params,
                                      n_features=C, dims=2)
    assert jnp.allclose(action, a_f32, atol=2e-2, rtol=5e-2)
    assert jnp.allclose(critic, c_f32, atol=2e-2, rtol=5e-2)

    # TODO(synk): get_action_and_value's Categorical sampling / log_prob /
    # entropy and the temperature parameter are host-side policy glue, not the
    # forward hot path; not implemented in-kernel.
    print("KERNEL_OK")
</pallas_src>

<mosaic_0001>
module attributes {stable_mosaic.version = 11 : i64} {
  func.func @_mlp_kernel(%arg0: i32, %arg1: memref<128x16xbf16, #tpu.memory_space<vmem>>, %arg2: memref<1x16x128xbf16, #tpu.memory_space<vmem>>, %arg3: memref<1x1x128xf32, #tpu.memory_space<vmem>>, %arg4: memref<1x7x128x128xbf16, #tpu.memory_space<vmem>>, %arg5: memref<1x7x1x128xf32, #tpu.memory_space<vmem>>, %arg6: memref<1x128x4xbf16, #tpu.memory_space<vmem>>, %arg7: memref<1x1x4xf32, #tpu.memory_space<vmem>>, %arg8: memref<128x4xf32, #tpu.memory_space<vmem>>) attributes {dimension_semantics = [#tpu.dimension_semantics<parallel>], iteration_bounds = array<i64: 2>, scalar_prefetch = 0 : i64, scratch_operands = 0 : i64, tpu.core_type = #tpu.core_type<tc>, window_params = [{transform_indices = @transform_0, window_bounds = array<i64: 128, 16>}, {transform_indices = @transform_1, window_bounds = array<i64: 1, 16, 128>}, {transform_indices = @transform_2, window_bounds = array<i64: 1, 1, 128>}, {transform_indices = @transform_3, window_bounds = array<i64: 1, 7, 128, 128>}, {transform_indices = @transform_4, window_bounds = array<i64: 1, 7, 1, 128>}, {transform_indices = @transform_5, window_bounds = array<i64: 1, 128, 4>}, {transform_indices = @transform_6, window_bounds = array<i64: 1, 1, 4>}, {transform_indices = @transform_7, window_bounds = array<i64: 128, 4>}]} {
    %c0 = arith.constant 0 : index
    %c0_0 = arith.constant 0 : index
    %0 = vector.load %arg1[%c0, %c0_0] : memref<128x16xbf16, #tpu.memory_space<vmem>>, vector<128x16xbf16>
    %c0_1 = arith.constant 0 : index
    %c0_2 = arith.constant 0 : index
    %c0_3 = arith.constant 0 : index
    %1 = vector.load %arg2[%c0_1, %c0_2, %c0_3] : memref<1x16x128xbf16, #tpu.memory_space<vmem>>, vector<1x16x128xbf16>
    %2 = vector.shape_cast %1 : vector<1x16x128xbf16> to vector<16x128xbf16>
    %cst = arith.constant dense<0.000000e+00> : vector<128x128xf32>
    %3 = tpu.matmul %0, %2, %cst {dimension_numbers = #tpu.dot_dimension_numbers<[1], [0], [0], [1], [0, 0, 1, 1], [], []>} : vector<128x16xbf16>, vector<16x128xbf16>, vector<128x128xf32> -> vector<128x128xf32>
    %c0_4 = arith.constant 0 : index
    %c0_5 = arith.constant 0 : index
    %c0_6 = arith.constant 0 : index
    %4 = vector.load %arg3[%c0_4, %c0_5, %c0_6] : memref<1x1x128xf32, #tpu.memory_space<vmem>>, vector<1x1x128xf32>
    %5 = vector.shape_cast %4 : vector<1x1x128xf32> to vector<1x128xf32>
    %6 = vector.broadcast %5 : vector<1x128xf32> to vector<128x128xf32>
    %7 = arith.addf %3, %6 : vector<128x128xf32>
    %cst_7 = arith.constant 0.000000e+00 : f32
    %8 = vector.broadcast %cst_7 : f32 to vector<128x128xf32>
    %9 = arith.cmpf ogt, %7, %8 : vector<128x128xf32>
    %cst_8 = arith.constant 0.00999999977 : f32
    %10 = vector.broadcast %cst_8 : f32 to vector<128x128xf32>
    %11 = arith.mulf %10, %7 : vector<128x128xf32>
    %12 = arith.select %9, %7, %11 : vector<128x128xi1>, vector<128x128xf32>
    %c0_i32 = arith.constant 0 : i32
    %13 = arith.truncf %12 : vector<128x128xf32> to vector<128x128xbf16>
    %c0_9 = arith.constant 0 : index
    %14 = arith.index_cast %c0_i32 : i32 to index
    %c0_10 = arith.constant 0 : index
    %c0_11 = arith.constant 0 : index
    %15 = vector.load %arg4[%c0_9, %14, %c0_10, %c0_11] : memref<1x7x128x128xbf16, #tpu.memory_space<vmem>>, vector<1x1x128x128xbf16>
    %16 = vector.shape_cast %15 : vector<1x1x128x128xbf16> to vector<128x128xbf16>
    %cst_12 = arith.constant dense<0.000000e+00> : vector<128x128xf32>
    %17 = tpu.matmul %13, %16, %cst_12 {dimension_numbers = #tpu.dot_dimension_numbers<[1], [0], [0], [1], [0, 0, 1, 1], [], []>} : vector<128x128xbf16>, vector<128x128xbf16>, vector<128x128xf32> -> vector<128x128xf32>
    %c0_13 = arith.constant 0 : index
    %18 = arith.index_cast %c0_i32 : i32 to index
    %c0_14 = arith.constant 0 : index
    %c0_15 = arith.constant 0 : index
    %19 = vector.load %arg5[%c0_13, %18, %c0_14, %c0_15] : memref<1x7x1x128xf32, #tpu.memory_space<vmem>>, vector<1x1x1x128xf32>
    %20 = vector.shape_cast %19 : vector<1x1x1x128xf32> to vector<1x128xf32>
    %21 = vector.broadcast %20 : vector<1x128xf32> to vector<128x128xf32>
    %22 = arith.addf %17, %21 : vector<128x128xf32>
    %cst_16 = arith.constant 0.000000e+00 : f32
    %23 = vector.broadcast %cst_16 : f32 to vector<128x128xf32>
    %24 = arith.cmpf ogt, %22, %23 : vector<128x128xf32>
    %cst_17 = arith.constant 0.00999999977 : f32
    %25 = vector.broadcast %cst_17 : f32 to vector<128x128xf32>
    %26 = arith.mulf %25, %22 : vector<128x128xf32>
    %27 = arith.select %24, %22, %26 : vector<128x128xi1>, vector<128x128xf32>
    %c1_i32 = arith.constant 1 : i32
    %28 = arith.truncf %27 : vector<128x128xf32> to vector<128x128xbf16>
    %c0_18 = arith.constant 0 : index
    %29 = arith.index_cast %c1_i32 : i32 to index
    %c0_19 = arith.constant 0 : index
    %c0_20 = arith.constant 0 : index
    %30 = vector.load %arg4[%c0_18, %29, %c0_19, %c0_20] : memref<1x7x128x128xbf16, #tpu.memory_space<vmem>>, vector<1x1x128x128xbf16>
    %31 = vector.shape_cast %30 : vector<1x1x128x128xbf16> to vector<128x128xbf16>
    %cst_21 = arith.constant dense<0.000000e+00> : vector<128x128xf32>
    %32 = tpu.matmul %28, %31, %cst_21 {dimension_numbers = #tpu.dot_dimension_numbers<[1], [0], [0], [1], [0, 0, 1, 1], [], []>} : vector<128x128xbf16>, vector<128x128xbf16>, vector<128x128xf32> -> vector<128x128xf32>
    %c0_22 = arith.constant 0 : index
    %33 = arith.index_cast %c1_i32 : i32 to index
    %c0_23 = arith.constant 0 : index
    %c0_24 = arith.constant 0 : index
    %34 = vector.load %arg5[%c0_22, %33, %c0_23, %c0_24] : memref<1x7x1x128xf32, #tpu.memory_space<vmem>>, vector<1x1x1x128xf32>
    %35 = vector.shape_cast %34 : vector<1x1x1x128xf32> to vector<1x128xf32>
    %36 = vector.broadcast %35 : vector<1x128xf32> to vector<128x128xf32>
    %37 = arith.addf %32, %36 : vector<128x128xf32>
    %cst_25 = arith.constant 0.000000e+00 : f32
    %38 = vector.broadcast %cst_25 : f32 to vector<128x128xf32>
    %39 = arith.cmpf ogt, %37, %38 : vector<128x128xf32>
    %cst_26 = arith.constant 0.00999999977 : f32
    %40 = vector.broadcast %cst_26 : f32 to vector<128x128xf32>
    %41 = arith.mulf %40, %37 : vector<128x128xf32>
    %42 = arith.select %39, %37, %41 : vector<128x128xi1>, vector<128x128xf32>
    %c2_i32 = arith.constant 2 : i32
    %43 = arith.truncf %42 : vector<128x128xf32> to vector<128x128xbf16>
    %c0_27 = arith.constant 0 : index
    %44 = arith.index_cast %c2_i32 : i32 to index
    %c0_28 = arith.constant 0 : index
    %c0_29 = arith.constant 0 : index
    %45 = vector.load %arg4[%c0_27, %44, %c0_28, %c0_29] : memref<1x7x128x128xbf16, #tpu.memory_space<vmem>>, vector<1x1x128x128xbf16>
    %46 = vector.shape_cast %45 : vector<1x1x128x128xbf16> to vector<128x128xbf16>
    %cst_30 = arith.constant dense<0.000000e+00> : vector<128x128xf32>
    %47 = tpu.matmul %43, %46, %cst_30 {dimension_numbers = #tpu.dot_dimension_numbers<[1], [0], [0], [1], [0, 0, 1, 1], [], []>} : vector<128x128xbf16>, vector<128x128xbf16>, vector<128x128xf32> -> vector<128x128xf32>
    %c0_31 = arith.constant 0 : index
    %48 = arith.index_cast %c2_i32 : i32 to index
    %c0_32 = arith.constant 0 : index
    %c0_33 = arith.constant 0 : index
    %49 = vector.load %arg5[%c0_31, %48, %c0_32, %c0_33] : memref<1x7x1x128xf32, #tpu.memory_space<vmem>>, vector<1x1x1x128xf32>
    %50 = vector.shape_cast %49 : vector<1x1x1x128xf32> to vector<1x128xf32>
    %51 = vector.broadcast %50 : vector<1x128xf32> to vector<128x128xf32>
    %52 = arith.addf %47, %51 : vector<128x128xf32>
    %cst_34 = arith.constant 0.000000e+00 : f32
    %53 = vector.broadcast %cst_34 : f32 to vector<128x128xf32>
    %54 = arith.cmpf ogt, %52, %53 : vector<128x128xf32>
    %cst_35 = arith.constant 0.00999999977 : f32
    %55 = vector.broadcast %cst_35 : f32 to vector<128x128xf32>
    %56 = arith.mulf %55, %52 : vector<128x128xf32>
    %57 = arith.select %54, %52, %56 : vector<128x128xi1>, vector<128x128xf32>
    %c3_i32 = arith.constant 3 : i32
    %58 = arith.truncf %57 : vector<128x128xf32> to vector<128x128xbf16>
    %c0_36 = arith.constant 0 : index
    %59 = arith.index_cast %c3_i32 : i32 to index
    %c0_37 = arith.constant 0 : index
    %c0_38 = arith.constant 0 : index
    %60 = vector.load %arg4[%c0_36, %59, %c0_37, %c0_38] : memref<1x7x128x128xbf16, #tpu.memory_space<vmem>>, vector<1x1x128x128xbf16>
    %61 = vector.shape_cast %60 : vector<1x1x128x128xbf16> to vector<128x128xbf16>
    %cst_39 = arith.constant dense<0.000000e+00> : vector<128x128xf32>
    %62 = tpu.matmul %58, %61, %cst_39 {dimension_numbers = #tpu.dot_dimension_numbers<[1], [0], [0], [1], [0, 0, 1, 1], [], []>} : vector<128x128xbf16>, vector<128x128xbf16>, vector<128x128xf32> -> vector<128x128xf32>
    %c0_40 = arith.constant 0 : index
    %63 = arith.index_cast %c3_i32 : i32 to index
    %c0_41 = arith.constant 0 : index
    %c0_42 = arith.constant 0 : index
    %64 = vector.load %arg5[%c0_40, %63, %c0_41, %c0_42] : memref<1x7x1x128xf32, #tpu.memory_space<vmem>>, vector<1x1x1x128xf32>
    %65 = vector.shape_cast %64 : vector<1x1x1x128xf32> to vector<1x128xf32>
    %66 = vector.broadcast %65 : vector<1x128xf32> to vector<128x128xf32>
    %67 = arith.addf %62, %66 : vector<128x128xf32>
    %cst_43 = arith.constant 0.000000e+00 : f32
    %68 = vector.broadcast %cst_43 : f32 to vector<128x128xf32>
    %69 = arith.cmpf ogt, %67, %68 : vector<128x128xf32>
    %cst_44 = arith.constant 0.00999999977 : f32
    %70 = vector.broadcast %cst_44 : f32 to vector<128x128xf32>
    %71 = arith.mulf %70, %67 : vector<128x128xf32>
    %72 = arith.select %69, %67, %71 : vector<128x128xi1>, vector<128x128xf32>
    %c4_i32 = arith.constant 4 : i32
    %73 = arith.truncf %72 : vector<128x128xf32> to vector<128x128xbf16>
    %c0_45 = arith.constant 0 : index
    %74 = arith.index_cast %c4_i32 : i32 to index
    %c0_46 = arith.constant 0 : index
    %c0_47 = arith.constant 0 : index
    %75 = vector.load %arg4[%c0_45, %74, %c0_46, %c0_47] : memref<1x7x128x128xbf16, #tpu.memory_space<vmem>>, vector<1x1x128x128xbf16>
    %76 = vector.shape_cast %75 : vector<1x1x128x128xbf16> to vector<128x128xbf16>
    %cst_48 = arith.constant dense<0.000000e+00> : vector<128x128xf32>
    %77 = tpu.matmul %73, %76, %cst_48 {dimension_numbers = #tpu.dot_dimension_numbers<[1], [0], [0], [1], [0, 0, 1, 1], [], []>} : vector<128x128xbf16>, vector<128x128xbf16>, vector<128x128xf32> -> vector<128x128xf32>
    %c0_49 = arith.constant 0 : index
    %78 = arith.index_cast %c4_i32 : i32 to index
    %c0_50 = arith.constant 0 : index
    %c0_51 = arith.constant 0 : index
    %79 = vector.load %arg5[%c0_49, %78, %c0_50, %c0_51] : memref<1x7x1x128xf32, #tpu.memory_space<vmem>>, vector<1x1x1x128xf32>
    %80 = vector.shape_cast %79 : vector<1x1x1x128xf32> to vector<1x128xf32>
    %81 = vector.broadcast %80 : vector<1x128xf32> to vector<128x128xf32>
    %82 = arith.addf %77, %81 : vector<128x128xf32>
    %cst_52 = arith.constant 0.000000e+00 : f32
    %83 = vector.broadcast %cst_52 : f32 to vector<128x128xf32>
    %84 = arith.cmpf ogt, %82, %83 : vector<128x128xf32>
    %cst_53 = arith.constant 0.00999999977 : f32
    %85 = vector.broadcast %cst_53 : f32 to vector<128x128xf32>
    %86 = arith.mulf %85, %82 : vector<128x128xf32>
    %87 = arith.select %84, %82, %86 : vector<128x128xi1>, vector<128x128xf32>
    %c5_i32 = arith.constant 5 : i32
    %88 = arith.truncf %87 : vector<128x128xf32> to vector<128x128xbf16>
    %c0_54 = arith.constant 0 : index
    %89 = arith.index_cast %c5_i32 : i32 to index
    %c0_55 = arith.constant 0 : index
    %c0_56 = arith.constant 0 : index
    %90 = vector.load %arg4[%c0_54, %89, %c0_55, %c0_56] : memref<1x7x128x128xbf16, #tpu.memory_space<vmem>>, vector<1x1x128x128xbf16>
    %91 = vector.shape_cast %90 : vector<1x1x128x128xbf16> to vector<128x128xbf16>
    %cst_57 = arith.constant dense<0.000000e+00> : vector<128x128xf32>
    %92 = tpu.matmul %88, %91, %cst_57 {dimension_numbers = #tpu.dot_dimension_numbers<[1], [0], [0], [1], [0, 0, 1, 1], [], []>} : vector<128x128xbf16>, vector<128x128xbf16>, vector<128x128xf32> -> vector<128x128xf32>
    %c0_58 = arith.constant 0 : index
    %93 = arith.index_cast %c5_i32 : i32 to index
    %c0_59 = arith.constant 0 : index
    %c0_60 = arith.constant 0 : index
    %94 = vector.load %arg5[%c0_58, %93, %c0_59, %c0_60] : memref<1x7x1x128xf32, #tpu.memory_space<vmem>>, vector<1x1x1x128xf32>
    %95 = vector.shape_cast %94 : vector<1x1x1x128xf32> to vector<1x128xf32>
    %96 = vector.broadcast %95 : vector<1x128xf32> to vector<128x128xf32>
    %97 = arith.addf %92, %96 : vector<128x128xf32>
    %cst_61 = arith.constant 0.000000e+00 : f32
    %98 = vector.broadcast %cst_61 : f32 to vector<128x128xf32>
    %99 = arith.cmpf ogt, %97, %98 : vector<128x128xf32>
    %cst_62 = arith.constant 0.00999999977 : f32
    %100 = vector.broadcast %cst_62 : f32 to vector<128x128xf32>
    %101 = arith.mulf %100, %97 : vector<128x128xf32>
    %102 = arith.select %99, %97, %101 : vector<128x128xi1>, vector<128x128xf32>
    %c6_i32 = arith.constant 6 : i32
    %103 = arith.truncf %102 : vector<128x128xf32> to vector<128x128xbf16>
    %c0_63 = arith.constant 0 : index
    %104 = arith.index_cast %c6_i32 : i32 to index
    %c0_64 = arith.constant 0 : index
    %c0_65 = arith.constant 0 : index
    %105 = vector.load %arg4[%c0_63, %104, %c0_64, %c0_65] : memref<1x7x128x128xbf16, #tpu.memory_space<vmem>>, vector<1x1x128x128xbf16>
    %106 = vector.shape_cast %105 : vector<1x1x128x128xbf16> to vector<128x128xbf16>
    %cst_66 = arith.constant dense<0.000000e+00> : vector<128x128xf32>
    %107 = tpu.matmul %103, %106, %cst_66 {dimension_numbers = #tpu.dot_dimension_numbers<[1], [0], [0], [1], [0, 0, 1, 1], [], []>} : vector<128x128xbf16>, vector<128x128xbf16>, vector<128x128xf32> -> vector<128x128xf32>
    %c0_67 = arith.constant 0 : index
    %108 = arith.index_cast %c6_i32 : i32 to index
    %c0_68 = arith.constant 0 : index
    %c0_69 = arith.constant 0 : index
    %109 = vector.load %arg5[%c0_67, %108, %c0_68, %c0_69] : memref<1x7x1x128xf32, #tpu.memory_space<vmem>>, vector<1x1x1x128xf32>
    %110 = vector.shape_cast %109 : vector<1x1x1x128xf32> to vector<1x128xf32>
    %111 = vector.broadcast %110 : vector<1x128xf32> to vector<128x128xf32>
    %112 = arith.addf %107, %111 : vector<128x128xf32>
    %cst_70 = arith.constant 0.000000e+00 : f32
    %113 = vector.broadcast %cst_70 : f32 to vector<128x128xf32>
    %114 = arith.cmpf ogt, %112, %113 : vector<128x128xf32>
    %cst_71 = arith.constant 0.00999999977 : f32
    %115 = vector.broadcast %cst_71 : f32 to vector<128x128xf32>
    %116 = arith.mulf %115, %112 : vector<128x128xf32>
    %117 = arith.select %114, %112, %116 : vector<128x128xi1>, vector<128x128xf32>
    %c7_i32 = arith.constant 7 : i32
    %118 = arith.truncf %117 : vector<128x128xf32> to vector<128x128xbf16>
    %c0_72 = arith.constant 0 : index
    %c0_73 = arith.constant 0 : index
    %c0_74 = arith.constant 0 : index
    %119 = vector.load %arg6[%c0_72, %c0_73, %c0_74] : memref<1x128x4xbf16, #tpu.memory_space<vmem>>, vector<1x128x4xbf16>
    %120 = vector.shape_cast %119 : vector<1x128x4xbf16> to vector<128x4xbf16>
    %cst_75 = arith.constant dense<0.000000e+00> : vector<128x4xf32>
    %121 = tpu.matmul %118, %120, %cst_75 {dimension_numbers = #tpu.dot_dimension_numbers<[1], [0], [0], [1], [0, 0, 1, 1], [], []>} : vector<128x128xbf16>, vector<128x4xbf16>, vector<128x4xf32> -> vector<128x4xf32>
    %c0_76 = arith.constant 0 : index
    %c0_77 = arith.constant 0 : index
    %c0_78 = arith.constant 0 : index
    %122 = vector.load %arg7[%c0_76, %c0_77, %c0_78] : memref<1x1x4xf32, #tpu.memory_space<vmem>>, vector<1x1x4xf32>
    %123 = vector.shape_cast %122 : vector<1x1x4xf32> to vector<1x4xf32>
    %124 = vector.broadcast %123 : vector<1x4xf32> to vector<128x4xf32>
    %125 = arith.addf %121, %124 : vector<128x4xf32>
    %cst_79 = arith.constant 0.000000e+00 : f32
    %126 = vector.broadcast %cst_79 : f32 to vector<128x4xf32>
    %127 = arith.cmpf ogt, %125, %126 : vector<128x4xf32>
    %cst_80 = arith.constant 0.00999999977 : f32
    %128 = vector.broadcast %cst_80 : f32 to vector<128x4xf32>
    %129 = arith.mulf %128, %125 : vector<128x4xf32>
    %130 = arith.select %127, %125, %129 : vector<128x4xi1>, vector<128x4xf32>
    %c0_81 = arith.constant 0 : index
    %c0_82 = arith.constant 0 : index
    %131 = vector.load %arg8[%c0_81, %c0_82] : memref<128x4xf32, #tpu.memory_space<vmem>>, vector<128x4xf32>
    tpu.vector_store %arg8[%c0_81, %c0_82], %130 {strides = array<i32>} : memref<128x4xf32, #tpu.memory_space<vmem>>, vector<128x4xf32>,
    return
  }
  func.func @transform_0(%arg0: i32) -> (i32, i32) {
    %c0_i32 = arith.constant 0 : i32
    %c0_i32_0 = arith.constant 0 : i32
    return %arg0, %c0_i32 : i32, i32
  }
  func.func @transform_1(%arg0: i32) -> (i32, i32, i32) {
    %c1_i32 = arith.constant 1 : i32
    %0 = arith.cmpi slt, %arg0, %c1_i32 : i32
    %c0_i32 = arith.constant 0 : i32
    %c1_i32_0 = arith.constant 1 : i32
    %1 = arith.select %0, %c0_i32, %c1_i32_0 : i32
    %c0_i32_1 = arith.constant 0 : i32
    %c0_i32_2 = arith.constant 0 : i32
    %c0_i32_3 = arith.constant 0 : i32
    return %1, %c0_i32_1, %c0_i32_2 : i32, i32, i32
  }
  func.func @transform_2(%arg0: i32) -> (i32, i32, i32) {
    %c1_i32 = arith.constant 1 : i32
    %0 = arith.cmpi slt, %arg0, %c1_i32 : i32
    %c0_i32 = arith.constant 0 : i32
    %c1_i32_0 = arith.constant 1 : i32
    %1 = arith.select %0, %c0_i32, %c1_i32_0 : i32
    %c0_i32_1 = arith.constant 0 : i32
    %c0_i32_2 = arith.constant 0 : i32
    %c0_i32_3 = arith.constant 0 : i32
    return %1, %c0_i32_1, %c0_i32_2 : i32, i32, i32
  }
  func.func @transform_3(%arg0: i32) -> (i32, i32, i32, i32) {
    %c1_i32 = arith.constant 1 : i32
    %0 = arith.cmpi slt, %arg0, %c1_i32 : i32
    %c0_i32 = arith.constant 0 : i32
    %c1_i32_0 = arith.constant 1 : i32
    %1 = arith.select %0, %c0_i32, %c1_i32_0 : i32
    %c0_i32_1 = arith.constant 0 : i32
    %c0_i32_2 = arith.constant 0 : i32
    %c0_i32_3 = arith.constant 0 : i32
    %c0_i32_4 = arith.constant 0 : i32
    return %1, %c0_i32_1, %c0_i32_2, %c0_i32_3 : i32, i32, i32, i32
  }
  func.func @transform_4(%arg0: i32) -> (i32, i32, i32, i32) {
    %c1_i32 = arith.constant 1 : i32
    %0 = arith.cmpi slt, %arg0, %c1_i32 : i32
    %c0_i32 = arith.constant 0 : i32
    %c1_i32_0 = arith.constant 1 : i32
    %1 = arith.select %0, %c0_i32, %c1_i32_0 : i32
    %c0_i32_1 = arith.constant 0 : i32
    %c0_i32_2 = arith.constant 0 : i32
    %c0_i32_3 = arith.constant 0 : i32
    %c0_i32_4 = arith.constant 0 : i32
    return %1, %c0_i32_1, %c0_i32_2, %c0_i32_3 : i32, i32, i32, i32
  }
  func.func @transform_5(%arg0: i32) -> (i32, i32, i32) {
    %c1_i32 = arith.constant 1 : i32
    %0 = arith.cmpi slt, %arg0, %c1_i32 : i32
    %c0_i32 = arith.constant 0 : i32
    %c1_i32_0 = arith.constant 1 : i32
    %1 = arith.select %0, %c0_i32, %c1_i32_0 : i32
    %c0_i32_1 = arith.constant 0 : i32
    %c0_i32_2 = arith.constant 0 : i32
    %c0_i32_3 = arith.constant 0 : i32
    return %1, %c0_i32_1, %c0_i32_2 : i32, i32, i32
  }
  func.func @transform_6(%arg0: i32) -> (i32, i32, i32) {
    %c1_i32 = arith.constant 1 : i32
    %0 = arith.cmpi slt, %arg0, %c1_i32 : i32
    %c0_i32 = arith.constant 0 : i32
    %c1_i32_0 = arith.constant 1 : i32
    %1 = arith.select %0, %c0_i32, %c1_i32_0 : i32
    %c0_i32_1 = arith.constant 0 : i32
    %c0_i32_2 = arith.constant 0 : i32
    %c0_i32_3 = arith.constant 0 : i32
    return %1, %c0_i32_1, %c0_i32_2 : i32, i32, i32
  }
  func.func @transform_7(%arg0: i32) -> (i32, i32) {
    %c0_i32 = arith.constant 0 : i32
    %c0_i32_0 = arith.constant 0 : i32
    return %arg0, %c0_i32 : i32, i32
  }
}

</mosaic_0001>

<bundles_post_ra>
// kernel: _agent_forward_impl.1
= control target key start
LH: loop header
LB: loop body
LE: loop exit
PB: predicated region body
PF: predicated region fallthrough
CT: control target
= control target key end

     0   :  { %s3408_s24 = smov 0   ;;  %s3746_s0 = inlined_call_operand.vmem [shape: bf16[256,16], index: 0, kind: input, shape index: {}]   ;;  %s3747_s1 = inlined_call_operand.vmem [shape: bf16[2,16,128], index: 1, kind: input, shape index: {}]   ;;  %s3748_s2 = inlined_call_operand.vmem [shape: f32[2,1,128], index: 2, kind: input, shape index: {}]   ;;  %s3749_s3 = inlined_call_operand.vmem [shape: bf16[2,7,128,128], index: 3, kind: input, shape index: {}]   ;;  %s3750_s4 = inlined_call_operand.vmem [shape: f32[2,7,1,128], index: 4, kind: input, shape index: {}]   ;;  %s3751_s5 = inlined_call_operand.vmem [shape: bf16[2,128,4], index: 5, kind: input, shape index: {}]   ;;  %s3752_s6 = inlined_call_operand.vmem [shape: f32[2,1,4], index: 6, kind: input, shape index: {}]   ;;  %s3753_s7 = inlined_call_operand.vmem [shape: f32[256,4], index: 7, kind: output, shape index: {}]  }
   0x1 LB: > { %s2656_s25 = sadd.s32 4294967295, %s3366_s24   ;;  %p2660_p0 = scmp.ge.s32.totalorder %s3366_s24, 1  ;;  %s3366_s24 = sphi %s3408_s24, %s17_s24  }
   0x2   : > { %p341_p1 = scmp.lt.s32.totalorder %s3366_s24, 3 }
   0x4   : > { %p342_p2 = pnand %p2660_p0, %p341_p1 }
   0x5   : > { %p416_p3 = scmp.ge.s32.totalorder (!%p342_p2), %s2656_s25, 1  ;;  %s2661_s26 = sshll.u32 (!%p342_p2), %s2656_s25, 4 }
   0x6   : > { %345 = sbr.rel (%p342_p2) target bundleno = 1908 (0x774), region = 48  ;;  %p411_p4 = scmp.lt.s32.totalorder (!%p342_p2), %s2661_s26, 31 }
   0xb   : > { %s417_s27 = scalar_select %p416_p3, 1, 0  ;;  %vm543_vm0 = vcmask 130048  }
   0xc   : > { %s3755_s26 = smov (!%p411_p4, %s2661_s26), 31 }
   0xd   : > { %p418_p5 = scmp.lt.s32.totalorder %s417_s27, 1  ;;  %s2662_s28 = sshll.u32 %s3755_s26, 2 }
   0xe   : > { %s3424_s8 = scalar_lea.vmem %s3746_s0, %s2662_s28  ;;  %s2669_s11 = sshll.u32 %s3755_s26, 3 }
   0xf   : > { %s3757_s27 = smov (!%p418_p5, %s417_s27), 1  ;;  %v3288_v0 = vld [vmem:[%s3424_s8] sm:$0xff]   ;;  %v3289_v2 = vld [vmem:[%s3424_s8 + $0x8] sm:$0xff]   ;;  %v3290_v3 = vld [vmem:[%s3424_s8 + $0x10] sm:$0xff]   ;;  %s3694_s14 = scalar_lea.vmem %s3753_s7, %s2669_s11 }
  0x10   : > { %s2864_s9 = sshll.u32 %s3757_s27, 3  ;;  %3005 = vmatprep.mubr.msk.bf16.mxu0 %vm543_vm0, %v3288_v0  ;;  %s3277_s13 = smul.u32 448, %s3757_s27  ;;  %v3291_v6 = vld [vmem:[%s3424_s8 + $0x18] sm:$0xff]   ;;  %v3292_v7 = vld [vmem:[%s3424_s8 + $0x20] sm:$0xff]   ;;  %v3293_v10 = vld [vmem:[%s3424_s8 + $0x28] sm:$0xff]  }
  0x11   : > { %s422_s12 = scalar_lea.vmem %s3747_s1, %s2864_s9  ;;  %s2865_s17 = sshll.u32 %s3757_s27, 6  ;;  %v3294_v11 = vld [vmem:[%s3424_s8 + $0x30] sm:$0xff]   ;;  %v3295_v13 = vld [vmem:[%s3424_s8 + $0x38] sm:$0xff]  }
  0x12   : > { %v3287_v1 = vld [vmem:[%s422_s12] sm:$0xff]   ;;  %s3438_s16 = scalar_lea.vmem %s3749_s3, %s3277_s13  ;;  %s3461_s20 = scalar_lea.vmem %s3751_s5, %s2865_s17 }
  0x13   : > { %3003 = vmatprep.subr.bf16.mxu0 %v3287_v1  ;;  %v3296_v4 = vld [vmem:[%s3438_s16 + $0x38] sm:$0xff]   ;;  %v3297_v5 = vld [vmem:[%s3438_s16 + $0x30] sm:$0xff]   ;;  %v3298_v8 = vld [vmem:[%s3438_s16 + $0x28] sm:$0xff]   ;;  %s429_s23 = scalar_lea.vmem %s3748_s2, %s3757_s27  ;;  %s3278_s25 = smul.u32 7, %s3757_s27 }
  0x14   : > { %3004 = vmatpush3.bf16.msra.mxu0 %v3287_v1  ;;  %3021 = vmatprep.subr.bf16.mxu1 %v3296_v4  ;;  %v3299_v9 = vld [vmem:[%s3438_s16 + $0x20] sm:$0xff]   ;;  %v3300_v12 = vld [vmem:[%s3438_s16 + $0x18] sm:$0xff]   ;;  %v3301_v14 = vld [vmem:[%s3438_s16 + $0x10] sm:$0xff]   ;;  %s462_s10 = scalar_lea.vmem %s3752_s6, %s3757_s27 }
  0x15   : > { %3022 = vmatpush3.bf16.msra.mxu1 %v3296_v4  ;;  %v3302_v15 = vld [vmem:[%s3438_s16 + $0x8] sm:$0xff]   ;;  %v3303_v16 = vld [vmem:[%s3438_s16] sm:$0xff]   ;;  %v3304_v17 = vld [vmem:[%s3438_s16 + $0x78] sm:$0xff]   ;;  %s3505_s30 = scalar_lea.vmem %s3750_s4, %s3278_s25 }
  0x16   : > { %3023 = vmatprep.subr.bf16.mxu1 %v3297_v5  ;;  %v3305_v18 = vld [vmem:[%s3438_s16 + $0x70] sm:$0xff]   ;;  %3053 = vmatprep.subr.bf16.mxu0 %v3304_v17  ;;  %v3306_v19 = vld [vmem:[%s3438_s16 + $0x68] sm:$0xff]   ;;  %v3307_v20 = vld [vmem:[%s3438_s16 + $0x60] sm:$0xff]  }
  0x17   : > { %3006 = vmatmul.mubr.msk.bf16.vlgmr.msra.gmra.mxu0 %vm543_vm0, %v3289_v2  ;;  %v3308_v21 = vld [vmem:[%s3438_s16 + $0x58] sm:$0xff]   ;;  %v3475_v23 = vld [vmem:[%s429_s23] ss:$0 sm:$0xff] }
  0x18   : > { %3009 = vmatprep.mubr.msk.bf16.mxu0 %vm543_vm0, %v3290_v3  ;;  %3054 = vmatpush3.bf16.msra.mxu0 %v3304_v17 }
  0x19   : > { %3024 = vmatpush3.bf16.msra.mxu1 %v3297_v5  ;;  %3055 = vmatprep.subr.bf16.mxu0 %v3305_v18 }
  0x1a   : > { %3025 = vmatprep.subr.bf16.mxu1 %v3298_v8 }
  0x1c   : > { %3056 = vmatpush3.bf16.msra.mxu0 %v3305_v18 }
  0x1d   : > { %3026 = vmatpush3.bf16.msra.mxu1 %v3298_v8  ;;  %3057 = vmatprep.subr.bf16.mxu0 %v3306_v19 }
  0x1e   : > { %3027 = vmatprep.subr.bf16.mxu1 %v3299_v9 }
  0x1f   : > { %3010 = vmatmul.mubr.msk.bf16.gmra.mxu0 %vm543_vm0, %v3291_v6 }
  0x20   : > { %3013 = vmatprep.mubr.msk.bf16.mxu0 %vm543_vm0, %v3292_v7  ;;  %3058 = vmatpush3.bf16.msra.mxu0 %v3306_v19 }
  0x21   : > { %3028 = vmatpush3.bf16.msra.mxu1 %v3299_v9  ;;  %3059 = vmatprep.subr.bf16.mxu0 %v3307_v20 }
  0x22   : > { %3029 = vmatprep.subr.bf16.mxu1 %v3300_v12 }
  0x24   : > { %3060 = vmatpush3.bf16.msra.mxu0 %v3307_v20 }
  0x25   : > { %3030 = vmatpush3.bf16.msra.mxu1 %v3300_v12  ;;  %3061 = vmatprep.subr.bf16.mxu0 %v3308_v21 }
  0x26   : > { %3031 = vmatprep.subr.bf16.mxu1 %v3301_v14 }
  0x27   : > { %3014 = vmatmul.mubr.msk.bf16.gmra.mxu0 %vm543_vm0, %v3293_v10 }
  0x28   : > { %3017 = vmatprep.mubr.msk.bf16.mxu0 %vm543_vm0, %v3294_v11  ;;  %3062 = vmatpush3.bf16.msra.mxu0 %v3308_v21 }
  0x29   : > { %3032 = vmatpush3.bf16.msra.mxu1 %v3301_v14 }
  0x2a   : > { %3033 = vmatprep.subr.bf16.mxu1 %v3302_v15 }
  0x2d   : > { %3034 = vmatpush3.bf16.msra.mxu1 %v3302_v15 }
  0x2e   : > { %3035 = vmatprep.subr.bf16.mxu1 %v3303_v16 }
  0x2f   : > { %3018 = vmatmul.mubr.msk.bf16.gmra.mxu0 %vm543_vm0, %v3295_v13 }
  0x31   : > { %3036 = vmatpush3.bf16.msra.mxu1 %v3303_v16 }
  0xd7   : > { %v3007_v22 = vpop.f32.mrf.mxu0 }
  0xd8   : > { %v611_v26 = vadd.f32 %v3007_v22, %v3475_v23 }
  0xd9   : > { %v602_v24 = vpop.f32.mrf.mxu0 }
  0xda   : > { %v603_v25 = vadd.f32 %v3475_v23, %v602_v24  ;;  %v683_v33 = vmul.f32 0.01, %v611_v26  ;;  %vm667_vm3 = vcmp.gt.f32.partialorder %v611_v26, 0.0 }
  0xdb   : > { %v3008_v27 = vpop.f32.mrf.mxu0 }
  0xdc   : > { %v614_v28 = vadd.f32 %v3008_v27, %v3475_v23  ;;  %v681_v30 = vmul.f32 0.01, %v603_v25  ;;  %vm665_vm2 = vcmp.gt.f32.partialorder %v603_v25, 0.0  ;;  %v699_v44 = vsel %vm667_vm3, %v611_v26, %v683_v33  ;;  %v3311_v33 = vld [vmem:[%s3438_s16 + $0x40] sm:$0xff]  }
  0xdd   : > { %v605_v29 = vpop.f32.mrf.mxu0 }
  0xde   : > { %vm668_vm1 = vcmp.gt.f32.partialorder %v614_v28, 0.0  ;;  %v684_v31 = vmul.f32 0.01, %v614_v28  ;;  %v606_v32 = vadd.f32 %v3475_v23, %v605_v29  ;;  %v697_v39 = vsel %vm665_vm2, %v603_v25, %v681_v30 }
  0xdf   : > { %v3011_v34 = vpop.f32.mrf.mxu0 }
  0xe0   : > { %v682_v35 = vmul.f32 0.01, %v606_v32  ;;  %vm666_vm4 = vcmp.gt.f32.partialorder %v606_v32, 0.0  ;;  %v700_v37 = vsel %vm668_vm1, %v614_v28, %v684_v31  ;;  %v627_v41 = vadd.f32 %v3011_v34, %v3475_v23  ;;  %v3312_v34 = vld [vmem:[%s3438_s16 + $0xb8] sm:$0xff]  }
  0xe1   : > { %v618_v36 = vpop.f32.mrf.mxu0  ;;  %v714_v46 = vpack.c.bf16 %v700_v37, %v699_v44  ;;  %3085 = vmatprep.subr.bf16.mxu1 %v3312_v34  ;;  %v3315_v37 = vld [vmem:[%s3438_s16 + $0xa0] sm:$0xff]  }
  0xe2   : > { %v619_v38 = vadd.f32 %v3475_v23, %v618_v36  ;;  %v698_v40 = vsel %vm666_vm4, %v606_v32, %v682_v35  ;;  %v687_v51 = vmul.f32 0.01, %v627_v41  ;;  %vm671_vm7 = vcmp.gt.f32.partialorder %v627_v41, 0.0  ;;  %v3310_v32 = vld [vmem:[%s3438_s16 + $0x48] sm:$0xff]   ;;  %v3313_v35 = vld [vmem:[%s3438_s16 + $0xb0] sm:$0xff]  }
  0xe3   : > { %v3012_v42 = vpop.f32.mrf.mxu0  ;;  %v713_v43 = vpack.c.bf16 %v698_v40, %v697_v39  ;;  %v3314_v36 = vld [vmem:[%s3438_s16 + $0xa8] sm:$0xff]   ;;  %v3508_v40 = vld [vmem:[%s3505_s30] ss:$0 sm:$0xff] }
  0xe4   : > { %v630_v45 = vadd.f32 %v3012_v42, %v3475_v23  ;;  %v685_v48 = vmul.f32 0.01, %v619_v38  ;;  %vm669_vm6 = vcmp.gt.f32.partialorder %v619_v38, 0.0  ;;  %v703_v62 = vsel %vm671_vm7, %v627_v41, %v687_v51 }
  0xe5   : > { %v621_v47 = vpop.f32.mrf.mxu0  ;;  %3037 = vmatprep.mubr.bf16.mxu1 %v713_v43 }
  0xe6   : > { %vm672_vm5 = vcmp.gt.f32.partialorder %v630_v45, 0.0  ;;  %v688_v49 = vmul.f32 0.01, %v630_v45  ;;  %v622_v50 = vadd.f32 %v3475_v23, %v621_v47  ;;  %3038 = vmatmul.mubr.bf16.vlgmr.msra.gmra.mxu1 %v714_v46  ;;  %v701_v57 = vsel %vm669_vm6, %v619_v38, %v685_v48  ;;  %v3316_v38 = vld [vmem:[%s3438_s16 + $0x98] sm:$0xff]  }
  0xe7   : > { %v3015_v52 = vpop.f32.mrf.mxu0  ;;  %3086 = vmatpush3.bf16.msra.mxu1 %v3312_v34 }
  0xe8   : > { %vm670_vm8 = vcmp.gt.f32.partialorder %v622_v50, 0.0  ;;  %v686_v53 = vmul.f32 0.01, %v622_v50  ;;  %v704_v55 = vsel %vm672_vm5, %v630_v45, %v688_v49  ;;  %v643_v59 = vadd.f32 %v3015_v52, %v3475_v23  ;;  %3087 = vmatprep.subr.bf16.mxu1 %v3313_v35 }
  0xe9   : > { %v634_v54 = vpop.f32.mrf.mxu0  ;;  %v716_v0 = vpack.c.bf16 %v704_v55, %v703_v62 }
  0xea   : > { %v635_v56 = vadd.f32 %v3475_v23, %v634_v54  ;;  %v702_v58 = vsel %vm670_vm8, %v622_v50, %v686_v53  ;;  %v691_v5 = vmul.f32 0.01, %v643_v59  ;;  %vm675_vm11 = vcmp.gt.f32.partialorder %v643_v59, 0.0 }
  0xeb   : > { %v3016_v60 = vpop.f32.mrf.mxu0  ;;  %v715_v61 = vpack.c.bf16 %v702_v58, %v701_v57  ;;  %3088 = vmatpush3.bf16.msra.mxu1 %v3313_v35 }
  0xec   : > { %v646_v63 = vadd.f32 %v3016_v60, %v3475_v23  ;;  %v689_v2 = vmul.f32 0.01, %v635_v56  ;;  %vm673_vm10 = vcmp.gt.f32.partialorder %v635_v56, 0.0  ;;  %v707_v16 = vsel %vm675_vm11, %v643_v59, %v691_v5  ;;  %3089 = vmatprep.subr.bf16.mxu1 %v3314_v36 }
  0xed   : > { %v637_v1 = vpop.f32.mrf.mxu0  ;;  %3041 = vmatprep.mubr.bf16.mxu1 %v715_v61 }
  0xee   : > { %vm676_vm9 = vcmp.gt.f32.partialorder %v646_v63, 0.0  ;;  %v692_v3 = vmul.f32 0.01, %v646_v63  ;;  %v638_v4 = vadd.f32 %v3475_v23, %v637_v1  ;;  %3042 = vmatmul.mubr.bf16.gmra.mxu1 %v716_v0  ;;  %v705_v11 = vsel %vm673_vm10, %v635_v56, %v689_v2 }
  0xef   : > { %v3019_v6 = vpop.f32.mrf.mxu0  ;;  %3090 = vmatpush3.bf16.msra.mxu1 %v3314_v36 }
  0xf0   : > { %vm674_vm12 = vcmp.gt.f32.partialorder %v638_v4, 0.0  ;;  %v690_v7 = vmul.f32 0.01, %v638_v4  ;;  %v708_v9 = vsel %vm676_vm9, %v646_v63, %v692_v3  ;;  %v659_v13 = vadd.f32 %v3019_v6, %v3475_v23  ;;  %3091 = vmatprep.subr.bf16.mxu1 %v3315_v37 }
  0xf1   : > { %v650_v8 = vpop.f32.mrf.mxu0  ;;  %v718_v18 = vpack.c.bf16 %v708_v9, %v707_v16 }
  0xf2   : > { %v651_v10 = vadd.f32 %v3475_v23, %v650_v8  ;;  %v706_v12 = vsel %vm674_vm12, %v638_v4, %v690_v7  ;;  %v695_v24 = vmul.f32 0.01, %v659_v13  ;;  %vm679_vm15 = vcmp.gt.f32.partialorder %v659_v13, 0.0 }
  0xf3   : > { %v3020_v14 = vpop.f32.mrf.mxu0  ;;  %v717_v15 = vpack.c.bf16 %v706_v12, %v705_v11  ;;  %3092 = vmatpush3.bf16.msra.mxu1 %v3315_v37 }
  0xf4   : > { %v662_v17 = vadd.f32 %v3020_v14, %v3475_v23  ;;  %v693_v20 = vmul.f32 0.01, %v651_v10  ;;  %vm677_vm14 = vcmp.gt.f32.partialorder %v651_v10, 0.0  ;;  %v711_v30 = vsel %vm679_vm15, %v659_v13, %v695_v24  ;;  %3093 = vmatprep.subr.bf16.mxu1 %v3316_v38 }
  0xf5   : > { %v653_v19 = vpop.f32.mrf.mxu0  ;;  %3045 = vmatprep.mubr.bf16.mxu1 %v717_v15 }
  0xf6   : > { %vm680_vm13 = vcmp.gt.f32.partialorder %v662_v17, 0.0  ;;  %v696_v21 = vmul.f32 0.01, %v662_v17  ;;  %v654_v22 = vadd.f32 %v3475_v23, %v653_v19  ;;  %3046 = vmatmul.mubr.bf16.gmra.mxu1 %v718_v18  ;;  %v709_v27 = vsel %vm677_vm14, %v651_v10, %v693_v20  ;;  %v3309_v23 = vld [vmem:[%s3438_s16 + $0x50] sm:$0xff]  }
  0xf7   : > { %3063 = vmatprep.subr.bf16.mxu0 %v3309_v23  ;;  %3094 = vmatpush3.bf16.msra.mxu1 %v3316_v38 }
  0xf8   : > { %vm678_vm0 = vcmp.gt.f32.partialorder %v654_v22, 0.0  ;;  %v694_v25 = vmul.f32 0.01, %v654_v22  ;;  %v712_v26 = vsel %vm680_vm13, %v662_v17, %v696_v21  ;;  %3064 = vmatpush3.bf16.msra.mxu0 %v3309_v23 }
  0xf9   : > { %v720_v31 = vpack.c.bf16 %v712_v26, %v711_v30  ;;  %3065 = vmatprep.subr.bf16.mxu0 %v3310_v32 }
  0xfa   : > { %v710_v28 = vsel %vm678_vm0, %v654_v22, %v694_v25 }
  0xfb   : > { %v719_v29 = vpack.c.bf16 %v710_v28, %v709_v27 }
  0xfc   : > { %3066 = vmatpush3.bf16.msra.mxu0 %v3310_v32 }
  0xfd   : > { %3049 = vmatprep.mubr.bf16.mxu1 %v719_v29  ;;  %3067 = vmatprep.subr.bf16.mxu0 %v3311_v33 }
  0xfe   : > { %3050 = vmatmul.mubr.bf16.gmra.mxu1 %v720_v31 }
 0x100   : > { %3068 = vmatpush3.bf16.msra.mxu0 %v3311_v33 }
 0x1a6   : > { %v3039_v39 = vpop.f32.mrf.mxu1 }
 0x1a7   : > { %v835_v43 = vadd.f32 %v3039_v39, %v3508_v40 }
 0x1a8   : > { %v826_v41 = vpop.f32.mrf.mxu1 }
 0x1a9   : > { %v827_v42 = vadd.f32 %v3508_v40, %v826_v41  ;;  %v907_v50 = vmul.f32 0.01, %v835_v43  ;;  %vm891_vm3 = vcmp.gt.f32.partialorder %v835_v43, 0.0 }
 0x1aa   : > { %v3040_v44 = vpop.f32.mrf.mxu1 }
 0x1ab   : > { %v838_v45 = vadd.f32 %v3040_v44, %v3508_v40  ;;  %v905_v47 = vmul.f32 0.01, %v827_v42  ;;  %vm889_vm2 = vcmp.gt.f32.partialorder %v827_v42, 0.0  ;;  %v923_v58 = vsel %vm891_vm3, %v835_v43, %v907_v50  ;;  %v3319_v50 = vld [vmem:[%s3438_s16 + $0x80] sm:$0xff]  }
 0x1ac   : > { %v829_v46 = vpop.f32.mrf.mxu1 }
 0x1ad   : > { %vm892_vm1 = vcmp.gt.f32.partialorder %v838_v45, 0.0  ;;  %v908_v48 = vmul.f32 0.01, %v838_v45  ;;  %v830_v49 = vadd.f32 %v3508_v40, %v829_v46  ;;  %v921_v56 = vsel %vm889_vm2, %v827_v42, %v905_v47 }
 0x1ae   : > { %v3043_v51 = vpop.f32.mrf.mxu1 }
 0x1af   : > { %vm890_vm4 = vcmp.gt.f32.partialorder %v830_v49, 0.0  ;;  %v906_v52 = vmul.f32 0.01, %v830_v49  ;;  %v924_v53 = vsel %vm892_vm1, %v838_v45, %v908_v48  ;;  %v851_v59 = vadd.f32 %v3043_v51, %v3508_v40  ;;  %v3320_v51 = vld [vmem:[%s3438_s16 + $0xf8] sm:$0xff]  }
 0x1b0   : > { %v842_v54 = vpop.f32.mrf.mxu1  ;;  %v938_v62 = vpack.c.bf16 %v924_v53, %v923_v58  ;;  %3117 = vmatprep.subr.bf16.mxu0 %v3320_v51  ;;  %v3322_v53 = vld [vmem:[%s3438_s16 + $0xe8] sm:$0xff]  }
 0x1b1   : > { %v843_v55 = vadd.f32 %v3508_v40, %v842_v54  ;;  %v922_v57 = vsel %vm890_vm4, %v830_v49, %v906_v52  ;;  %v911_v4 = vmul.f32 0.01, %v851_v59  ;;  %vm895_vm7 = vcmp.gt.f32.partialorder %v851_v59, 0.0  ;;  %v3318_v49 = vld [vmem:[%s3438_s16 + $0x88] sm:$0xff]   ;;  %v3321_v52 = vld [vmem:[%s3438_s16 + $0xf0] sm:$0xff]   ;;  %v3323_v54 = vld [vmem:[%s3438_s16 + $0xe0] sm:$0xff]  }
 0x1b2   : > { %v3044_v60 = vpop.f32.mrf.mxu1  ;;  %v937_v61 = vpack.c.bf16 %v922_v57, %v921_v56  ;;  %v3535_v57 = vld [vmem:[%s3505_s30 + $0x1] ss:$0 sm:$0xff] }
 0x1b3   : > { %v854_v63 = vadd.f32 %v3044_v60, %v3508_v40  ;;  %v909_v1 = vmul.f32 0.01, %v843_v55  ;;  %vm893_vm6 = vcmp.gt.f32.partialorder %v843_v55, 0.0  ;;  %v927_v15 = vsel %vm895_vm7, %v851_v59, %v911_v4 }
 0x1b4   : > { %v845_v0 = vpop.f32.mrf.mxu1  ;;  %3069 = vmatprep.mubr.bf16.mxu0 %v937_v61 }
 0x1b5   : > { %vm896_vm5 = vcmp.gt.f32.partialorder %v854_v63, 0.0  ;;  %v912_v2 = vmul.f32 0.01, %v854_v63  ;;  %v846_v3 = vadd.f32 %v3508_v40, %v845_v0  ;;  %3070 = vmatmul.mubr.bf16.vlgmr.msra.gmra.mxu0 %v938_v62  ;;  %v925_v10 = vsel %vm893_vm6, %v843_v55, %v909_v1  ;;  %v3324_v55 = vld [vmem:[%s3438_s16 + $0xd8] sm:$0xff]  }
 0x1b6   : > { %v3047_v5 = vpop.f32.mrf.mxu1  ;;  %3118 = vmatpush3.bf16.msra.mxu0 %v3320_v51 }
 0x1b7   : > { %vm894_vm8 = vcmp.gt.f32.partialorder %v846_v3, 0.0  ;;  %v910_v6 = vmul.f32 0.01, %v846_v3  ;;  %v928_v8 = vsel %vm896_vm5, %v854_v63, %v912_v2  ;;  %v867_v12 = vadd.f32 %v3047_v5, %v3508_v40  ;;  %3119 = vmatprep.subr.bf16.mxu0 %v3321_v52 }
 0x1b8   : > { %v858_v7 = vpop.f32.mrf.mxu1  ;;  %v940_v17 = vpack.c.bf16 %v928_v8, %v927_v15 }
 0x1b9   : > { %v859_v9 = vadd.f32 %v3508_v40, %v858_v7  ;;  %v926_v11 = vsel %vm894_vm8, %v846_v3, %v910_v6  ;;  %v915_v22 = vmul.f32 0.01, %v867_v12  ;;  %vm899_vm11 = vcmp.gt.f32.partialorder %v867_v12, 0.0 }
 0x1ba   : > { %v3048_v13 = vpop.f32.mrf.mxu1  ;;  %v939_v14 = vpack.c.bf16 %v926_v11, %v925_v10  ;;  %3120 = vmatpush3.bf16.msra.mxu0 %v3321_v52 }
 0x1bb   : > { %v870_v16 = vadd.f32 %v3048_v13, %v3508_v40  ;;  %v913_v19 = vmul.f32 0.01, %v859_v9  ;;  %vm897_vm10 = vcmp.gt.f32.partialorder %v859_v9, 0.0  ;;  %v931_v33 = vsel %vm899_vm11, %v867_v12, %v915_v22  ;;  %3121 = vmatprep.subr.bf16.mxu0 %v3322_v53 }
 0x1bc   : > { %v861_v18 = vpop.f32.mrf.mxu1  ;;  %3073 = vmatprep.mubr.bf16.mxu0 %v939_v14 }
 0x1bd   : > { %vm900_vm9 = vcmp.gt.f32.partialorder %v870_v16, 0.0  ;;  %v916_v20 = vmul.f32 0.01, %v870_v16  ;;  %v862_v21 = vadd.f32 %v3508_v40, %v861_v18  ;;  %3074 = vmatmul.mubr.bf16.gmra.mxu0 %v940_v17  ;;  %v929_v29 = vsel %vm897_vm10, %v859_v9, %v913_v19 }
 0x1be   : > { %v3051_v24 = vpop.f32.mrf.mxu1  ;;  %3122 = vmatpush3.bf16.msra.mxu0 %v3322_v53 }
 0x1bf   : > { %vm898_vm12 = vcmp.gt.f32.partialorder %v862_v21, 0.0  ;;  %v914_v25 = vmul.f32 0.01, %v862_v21  ;;  %v932_v27 = vsel %vm900_vm9, %v870_v16, %v916_v20  ;;  %v883_v31 = vadd.f32 %v3051_v24, %v3508_v40  ;;  %3123 = vmatprep.subr.bf16.mxu0 %v3323_v54 }
 0x1c0   : > { %v874_v26 = vpop.f32.mrf.mxu1  ;;  %v942_v35 = vpack.c.bf16 %v932_v27, %v931_v33 }
 0x1c1   : > { %v875_v28 = vadd.f32 %v3508_v40, %v874_v26  ;;  %v930_v30 = vsel %vm898_vm12, %v862_v21, %v914_v25  ;;  %v919_v41 = vmul.f32 0.01, %v883_v31  ;;  %vm903_vm15 = vcmp.gt.f32.partialorder %v883_v31, 0.0 }
 0x1c2   : > { %v3052_v23 = vpop.f32.mrf.mxu1  ;;  %v941_v32 = vpack.c.bf16 %v930_v30, %v929_v29  ;;  %3124 = vmatpush3.bf16.msra.mxu0 %v3323_v54 }
 0x1c3   : > { %v886_v34 = vadd.f32 %v3052_v23, %v3508_v40  ;;  %v917_v37 = vmul.f32 0.01, %v875_v28  ;;  %vm901_vm14 = vcmp.gt.f32.partialorder %v875_v28, 0.0  ;;  %v935_v47 = vsel %vm903_vm15, %v883_v31, %v919_v41  ;;  %3125 = vmatprep.subr.bf16.mxu0 %v3324_v55 }
 0x1c4   : > { %v877_v36 = vpop.f32.mrf.mxu1  ;;  %3077 = vmatprep.mubr.bf16.mxu0 %v941_v32 }
 0x1c5   : > { %vm904_vm13 = vcmp.gt.f32.partialorder %v886_v34, 0.0  ;;  %v920_v38 = vmul.f32 0.01, %v886_v34  ;;  %v878_v39 = vadd.f32 %v3508_v40, %v877_v36  ;;  %3078 = vmatmul.mubr.bf16.gmra.mxu0 %v942_v35  ;;  %v933_v44 = vsel %vm901_vm14, %v875_v28, %v917_v37  ;;  %v3317_v40 = vld [vmem:[%s3438_s16 + $0x90] sm:$0xff]  }
 0x1c6   : > { %3095 = vmatprep.subr.bf16.mxu1 %v3317_v40  ;;  %3126 = vmatpush3.bf16.msra.mxu0 %v3324_v55 }
 0x1c7   : > { %vm902_vm0 = vcmp.gt.f32.partialorder %v878_v39, 0.0  ;;  %v918_v42 = vmul.f32 0.01, %v878_v39  ;;  %v936_v43 = vsel %vm904_vm13, %v886_v34, %v920_v38  ;;  %3096 = vmatpush3.bf16.msra.mxu1 %v3317_v40 }
 0x1c8   : > { %v944_v48 = vpack.c.bf16 %v936_v43, %v935_v47  ;;  %3097 = vmatprep.subr.bf16.mxu1 %v3318_v49 }
 0x1c9   : > { %v934_v45 = vsel %vm902_vm0, %v878_v39, %v918_v42 }
 0x1ca   : > { %v943_v46 = vpack.c.bf16 %v934_v45, %v933_v44 }
 0x1cb   : > { %3098 = vmatpush3.bf16.msra.mxu1 %v3318_v49 }
 0x1cc   : > { %3081 = vmatprep.mubr.bf16.mxu0 %v943_v46  ;;  %3099 = vmatprep.subr.bf16.mxu1 %v3319_v50 }
 0x1cd   : > { %3082 = vmatmul.mubr.bf16.gmra.mxu0 %v944_v48 }
 0x1cf   : > { %3100 = vmatpush3.bf16.msra.mxu1 %v3319_v50 }
 0x275   : > { %v3071_v56 = vpop.f32.mrf.mxu0 }
 0x276   : > { %v1061_v60 = vadd.f32 %v3071_v56, %v3535_v57 }
 0x277   : > { %v1052_v58 = vpop.f32.mrf.mxu0 }
 0x278   : > { %v1053_v59 = vadd.f32 %v3535_v57, %v1052_v58  ;;  %v1133_v3 = vmul.f32 0.01, %v1061_v60  ;;  %vm1117_vm3 = vcmp.gt.f32.partialorder %v1061_v60, 0.0 }
 0x279   : > { %v3072_v61 = vpop.f32.mrf.mxu0 }
 0x27a   : > { %v1064_v62 = vadd.f32 %v3072_v61, %v3535_v57  ;;  %v1131_v0 = vmul.f32 0.01, %v1053_v59  ;;  %vm1115_vm2 = vcmp.gt.f32.partialorder %v1053_v59, 0.0  ;;  %v1149_v11 = vsel %vm1117_vm3, %v1061_v60, %v1133_v3  ;;  %v3327_v3 = vld [vmem:[%s3438_s16 + $0xc0] sm:$0xff]  }
 0x27b   : > { %v1055_v63 = vpop.f32.mrf.mxu0 }
 0x27c   : > { %vm1118_vm1 = vcmp.gt.f32.partialorder %v1064_v62, 0.0  ;;  %v1134_v1 = vmul.f32 0.01, %v1064_v62  ;;  %v1056_v2 = vadd.f32 %v3535_v57, %v1055_v63  ;;  %v1147_v9 = vsel %vm1115_vm2, %v1053_v59, %v1131_v0 }
 0x27d   : > { %v3075_v4 = vpop.f32.mrf.mxu0 }
 0x27e   : > { %vm1116_vm4 = vcmp.gt.f32.partialorder %v1056_v2, 0.0  ;;  %v1132_v5 = vmul.f32 0.01, %v1056_v2  ;;  %v1150_v6 = vsel %vm1118_vm1, %v1064_v62, %v1134_v1  ;;  %v1077_v12 = vadd.f32 %v3075_v4, %v3535_v57  ;;  %v3328_v4 = vld [vmem:[%s3438_s16 + $0x138] sm:$0xff]  }
 0x27f   : > { %v1068_v7 = vpop.f32.mrf.mxu0  ;;  %v1164_v15 = vpack.c.bf16 %v1150_v6, %v1149_v11  ;;  %3149 = vmatprep.subr.bf16.mxu1 %v3328_v4  ;;  %v3330_v6 = vld [vmem:[%s3438_s16 + $0x128] sm:$0xff]  }
 0x280   : > { %v1069_v8 = vadd.f32 %v3535_v57, %v1068_v7  ;;  %v1148_v10 = vsel %vm1116_vm4, %v1056_v2, %v1132_v5  ;;  %v1137_v21 = vmul.f32 0.01, %v1077_v12  ;;  %vm1121_vm7 = vcmp.gt.f32.partialorder %v1077_v12, 0.0  ;;  %v3326_v2 = vld [vmem:[%s3438_s16 + $0xc8] sm:$0xff]   ;;  %v3329_v5 = vld [vmem:[%s3438_s16 + $0x130] sm:$0xff]   ;;  %v3331_v7 = vld [vmem:[%s3438_s16 + $0x120] sm:$0xff]  }
 0x281   : > { %v3076_v13 = vpop.f32.mrf.mxu0  ;;  %v1163_v14 = vpack.c.bf16 %v1148_v10, %v1147_v9  ;;  %v3562_v10 = vld [vmem:[%s3505_s30 + $0x2] ss:$0 sm:$0xff] }
 0x282   : > { %v1080_v16 = vadd.f32 %v3076_v13, %v3535_v57  ;;  %v1135_v18 = vmul.f32 0.01, %v1069_v8  ;;  %vm1119_vm6 = vcmp.gt.f32.partialorder %v1069_v8, 0.0  ;;  %v1153_v32 = vsel %vm1121_vm7, %v1077_v12, %v1137_v21 }
 0x283   : > { %v1071_v17 = vpop.f32.mrf.mxu0  ;;  %3101 = vmatprep.mubr.bf16.mxu1 %v1163_v14 }
 0x284   : > { %vm1122_vm5 = vcmp.gt.f32.partialorder %v1080_v16, 0.0  ;;  %v1138_v19 = vmul.f32 0.01, %v1080_v16  ;;  %v1072_v20 = vadd.f32 %v3535_v57, %v1071_v17  ;;  %3102 = vmatmul.mubr.bf16.vlgmr.msra.gmra.mxu1 %v1164_v15  ;;  %v1151_v28 = vsel %vm1119_vm6, %v1069_v8, %v1135_v18  ;;  %v3332_v8 = vld [vmem:[%s3438_s16 + $0x118] sm:$0xff]  }
 0x285   : > { %v3079_v22 = vpop.f32.mrf.mxu0  ;;  %3150 = vmatpush3.bf16.msra.mxu1 %v3328_v4 }
 0x286   : > { %vm1120_vm8 = vcmp.gt.f32.partialorder %v1072_v20, 0.0  ;;  %v1136_v24 = vmul.f32 0.01, %v1072_v20  ;;  %v1154_v26 = vsel %vm1122_vm5, %v1080_v16, %v1138_v19  ;;  %v1093_v30 = vadd.f32 %v3079_v22, %v3535_v57  ;;  %3151 = vmatprep.subr.bf16.mxu1 %v3329_v5 }
 0x287   : > { %v1084_v25 = vpop.f32.mrf.mxu0  ;;  %v1166_v34 = vpack.c.bf16 %v1154_v26, %v1153_v32 }
 0x288   : > { %v1085_v27 = vadd.f32 %v3535_v57, %v1084_v25  ;;  %v1152_v29 = vsel %vm1120_vm8, %v1072_v20, %v1136_v24  ;;  %v1141_v39 = vmul.f32 0.01, %v1093_v30  ;;  %vm1125_vm11 = vcmp.gt.f32.partialorder %v1093_v30, 0.0 }
 0x289   : > { %v3080_v31 = vpop.f32.mrf.mxu0  ;;  %v1165_v23 = vpack.c.bf16 %v1152_v29, %v1151_v28  ;;  %3152 = vmatpush3.bf16.msra.mxu1 %v3329_v5 }
 0x28a   : > { %v1096_v33 = vadd.f32 %v3080_v31, %v3535_v57  ;;  %v1139_v36 = vmul.f32 0.01, %v1085_v27  ;;  %vm1123_vm10 = vcmp.gt.f32.partialorder %v1085_v27, 0.0  ;;  %v1157_v50 = vsel %vm1125_vm11, %v1093_v30, %v1141_v39  ;;  %3153 = vmatprep.subr.bf16.mxu1 %v3330_v6 }
 0x28b   : > { %v1087_v35 = vpop.f32.mrf.mxu0  ;;  %3105 = vmatprep.mubr.bf16.mxu1 %v1165_v23 }
 0x28c   : > { %vm1126_vm9 = vcmp.gt.f32.partialorder %v1096_v33, 0.0  ;;  %v1142_v37 = vmul.f32 0.01, %v1096_v33  ;;  %v1088_v38 = vadd.f32 %v3535_v57, %v1087_v35  ;;  %3106 = vmatmul.mubr.bf16.gmra.mxu1 %v1166_v34  ;;  %v1155_v46 = vsel %vm1123_vm10, %v1085_v27, %v1139_v36 }
 0x28d   : > { %v3083_v41 = vpop.f32.mrf.mxu0  ;;  %3154 = vmatpush3.bf16.msra.mxu1 %v3330_v6 }
 0x28e   : > { %vm1124_vm12 = vcmp.gt.f32.partialorder %v1088_v38, 0.0  ;;  %v1140_v42 = vmul.f32 0.01, %v1088_v38  ;;  %v1158_v44 = vsel %vm1126_vm9, %v1096_v33, %v1142_v37  ;;  %v1109_v48 = vadd.f32 %v3083_v41, %v3535_v57  ;;  %3155 = vmatprep.subr.bf16.mxu1 %v3331_v7 }
 0x28f   : > { %v1100_v43 = vpop.f32.mrf.mxu0  ;;  %v1168_v52 = vpack.c.bf16 %v1158_v44, %v1157_v50 }
 0x290   : > { %v1101_v45 = vadd.f32 %v3535_v57, %v1100_v43  ;;  %v1156_v47 = vsel %vm1124_vm12, %v1088_v38, %v1140_v42  ;;  %v1145_v58 = vmul.f32 0.01, %v1109_v48  ;;  %vm1129_vm15 = vcmp.gt.f32.partialorder %v1109_v48, 0.0 }
 0x291   : > { %v3084_v40 = vpop.f32.mrf.mxu0  ;;  %v1167_v49 = vpack.c.bf16 %v1156_v47, %v1155_v46  ;;  %3156 = vmatpush3.bf16.msra.mxu1 %v3331_v7 }
 0x292   : > { %v1112_v51 = vadd.f32 %v3084_v40, %v3535_v57  ;;  %v1143_v54 = vmul.f32 0.01, %v1101_v45  ;;  %vm1127_vm14 = vcmp.gt.f32.partialorder %v1101_v45, 0.0  ;;  %v1161_v0 = vsel %vm1129_vm15, %v1109_v48, %v1145_v58  ;;  %3157 = vmatprep.subr.bf16.mxu1 %v3332_v8 }
 0x293   : > { %v1103_v53 = vpop.f32.mrf.mxu0  ;;  %3109 = vmatprep.mubr.bf16.mxu1 %v1167_v49 }
 0x294   : > { %vm1130_vm13 = vcmp.gt.f32.partialorder %v1112_v51, 0.0  ;;  %v1146_v55 = vmul.f32 0.01, %v1112_v51  ;;  %v1104_v56 = vadd.f32 %v3535_v57, %v1103_v53  ;;  %3110 = vmatmul.mubr.bf16.gmra.mxu1 %v1168_v52  ;;  %v1159_v61 = vsel %vm1127_vm14, %v1101_v45, %v1143_v54  ;;  %v3325_v57 = vld [vmem:[%s3438_s16 + $0xd0] sm:$0xff]  }
 0x295   : > { %3127 = vmatprep.subr.bf16.mxu0 %v3325_v57  ;;  %3158 = vmatpush3.bf16.msra.mxu1 %v3332_v8 }
 0x296   : > { %vm1128_vm0 = vcmp.gt.f32.partialorder %v1104_v56, 0.0  ;;  %v1144_v59 = vmul.f32 0.01, %v1104_v56  ;;  %v1162_v60 = vsel %vm1130_vm13, %v1112_v51, %v1146_v55  ;;  %3128 = vmatpush3.bf16.msra.mxu0 %v3325_v57 }
 0x297   : > { %v1170_v1 = vpack.c.bf16 %v1162_v60, %v1161_v0  ;;  %3129 = vmatprep.subr.bf16.mxu0 %v3326_v2 }
 0x298   : > { %v1160_v62 = vsel %vm1128_vm0, %v1104_v56, %v1144_v59 }
 0x299   : > { %v1169_v63 = vpack.c.bf16 %v1160_v62, %v1159_v61 }
 0x29a   : > { %3130 = vmatpush3.bf16.msra.mxu0 %v3326_v2 }
 0x29b   : > { %3113 = vmatprep.mubr.bf16.mxu1 %v1169_v63  ;;  %3131 = vmatprep.subr.bf16.mxu0 %v3327_v3 }
 0x29c   : > { %3114 = vmatmul.mubr.bf16.gmra.mxu1 %v1170_v1 }
 0x29e   : > { %3132 = vmatpush3.bf16.msra.mxu0 %v3327_v3 }
 0x344   : > { %v3103_v9 = vpop.f32.mrf.mxu1 }
 0x345   : > { %v1287_v13 = vadd.f32 %v3103_v9, %v3562_v10 }
 0x346   : > { %v1278_v11 = vpop.f32.mrf.mxu1 }
 0x347   : > { %v1279_v12 = vadd.f32 %v3562_v10, %v1278_v11  ;;  %v1359_v20 = vmul.f32 0.01, %v1287_v13  ;;  %vm1343_vm3 = vcmp.gt.f32.partialorder %v1287_v13, 0.0 }
 0x348   : > { %v3104_v14 = vpop.f32.mrf.mxu1 }
 0x349   : > { %v1290_v15 = vadd.f32 %v3104_v14, %v3562_v10  ;;  %v1357_v17 = vmul.f32 0.01, %v1279_v12  ;;  %vm1341_vm2 = vcmp.gt.f32.partialorder %v1279_v12, 0.0  ;;  %v1375_v29 = vsel %vm1343_vm3, %v1287_v13, %v1359_v20  ;;  %v3335_v20 = vld [vmem:[%s3438_s16 + $0x100] sm:$0xff]  }
 0x34a   : > { %v1281_v16 = vpop.f32.mrf.mxu1 }
 0x34b   : > { %vm1344_vm1 = vcmp.gt.f32.partialorder %v1290_v15, 0.0  ;;  %v1360_v18 = vmul.f32 0.01, %v1290_v15  ;;  %v1282_v19 = vadd.f32 %v3562_v10, %v1281_v16  ;;  %v1373_v27 = vsel %vm1341_vm2, %v1279_v12, %v1357_v17 }
 0x34c   : > { %v3107_v21 = vpop.f32.mrf.mxu1 }
 0x34d   : > { %vm1342_vm4 = vcmp.gt.f32.partialorder %v1282_v19, 0.0  ;;  %v1358_v22 = vmul.f32 0.01, %v1282_v19  ;;  %v1376_v24 = vsel %vm1344_vm1, %v1290_v15, %v1360_v18  ;;  %v1303_v30 = vadd.f32 %v3107_v21, %v3562_v10  ;;  %v3336_v21 = vld [vmem:[%s3438_s16 + $0x178] sm:$0xff]  }
 0x34e   : > { %v1294_v25 = vpop.f32.mrf.mxu1  ;;  %v1390_v32 = vpack.c.bf16 %v1376_v24, %v1375_v29  ;;  %3181 = vmatprep.subr.bf16.mxu0 %v3336_v21  ;;  %v3338_v24 = vld [vmem:[%s3438_s16 + $0x168] sm:$0xff]  }
 0x34f   : > { %v1295_v26 = vadd.f32 %v3562_v10, %v1294_v25  ;;  %v1374_v28 = vsel %vm1342_vm4, %v1282_v19, %v1358_v22  ;;  %v1363_v38 = vmul.f32 0.01, %v1303_v30  ;;  %vm1347_vm7 = vcmp.gt.f32.partialorder %v1303_v30, 0.0  ;;  %v3334_v19 = vld [vmem:[%s3438_s16 + $0x108] sm:$0xff]   ;;  %v3337_v22 = vld [vmem:[%s3438_s16 + $0x170] sm:$0xff]   ;;  %v3339_v25 = vld [vmem:[%s3438_s16 + $0x160] sm:$0xff]  }
 0x350   : > { %v3108_v31 = vpop.f32.mrf.mxu1  ;;  %v1389_v23 = vpack.c.bf16 %v1374_v28, %v1373_v27  ;;  %v3589_v28 = vld [vmem:[%s3505_s30 + $0x3] ss:$0 sm:$0xff] }
 0x351   : > { %v1306_v33 = vadd.f32 %v3108_v31, %v3562_v10  ;;  %v1361_v35 = vmul.f32 0.01, %v1295_v26  ;;  %vm1345_vm6 = vcmp.gt.f32.partialorder %v1295_v26, 0.0  ;;  %v1379_v49 = vsel %vm1347_vm7, %v1303_v30, %v1363_v38 }
 0x352   : > { %v1297_v34 = vpop.f32.mrf.mxu1  ;;  %3133 = vmatprep.mubr.bf16.mxu0 %v1389_v23 }
 0x353   : > { %vm1348_vm5 = vcmp.gt.f32.partialorder %v1306_v33, 0.0  ;;  %v1364_v36 = vmul.f32 0.01, %v1306_v33  ;;  %v1298_v37 = vadd.f32 %v3562_v10, %v1297_v34  ;;  %3134 = vmatmul.mubr.bf16.vlgmr.msra.gmra.mxu0 %v1390_v32  ;;  %v1377_v45 = vsel %vm1345_vm6, %v1295_v26, %v1361_v35  ;;  %v3340_v26 = vld [vmem:[%s3438_s16 + $0x158] sm:$0xff]  }
 0x354   : > { %v3111_v39 = vpop.f32.mrf.mxu1  ;;  %3182 = vmatpush3.bf16.msra.mxu0 %v3336_v21 }
 0x355   : > { %vm1346_vm8 = vcmp.gt.f32.partialorder %v1298_v37, 0.0  ;;  %v1362_v41 = vmul.f32 0.01, %v1298_v37  ;;  %v1380_v43 = vsel %vm1348_vm5, %v1306_v33, %v1364_v36  ;;  %v1319_v47 = vadd.f32 %v3111_v39, %v3562_v10  ;;  %3183 = vmatprep.subr.bf16.mxu0 %v3337_v22 }
 0x356   : > { %v1310_v42 = vpop.f32.mrf.mxu1  ;;  %v1392_v51 = vpack.c.bf16 %v1380_v43, %v1379_v49 }
 0x357   : > { %v1311_v44 = vadd.f32 %v3562_v10, %v1310_v42  ;;  %v1378_v46 = vsel %vm1346_vm8, %v1298_v37, %v1362_v41  ;;  %v1367_v56 = vmul.f32 0.01, %v1319_v47  ;;  %vm1351_vm11 = vcmp.gt.f32.partialorder %v1319_v47, 0.0 }
 0x358   : > { %v3112_v48 = vpop.f32.mrf.mxu1  ;;  %v1391_v40 = vpack.c.bf16 %v1378_v46, %v1377_v45  ;;  %3184 = vmatpush3.bf16.msra.mxu0 %v3337_v22 }
 0x359   : > { %v1322_v50 = vadd.f32 %v3112_v48, %v3562_v10  ;;  %v1365_v53 = vmul.f32 0.01, %v1311_v44  ;;  %vm1349_vm10 = vcmp.gt.f32.partialorder %v1311_v44, 0.0  ;;  %v1383_v3 = vsel %vm1351_vm11, %v1319_v47, %v1367_v56  ;;  %3185 = vmatprep.subr.bf16.mxu0 %v3338_v24 }
 0x35a   : > { %v1313_v52 = vpop.f32.mrf.mxu1  ;;  %3137 = vmatprep.mubr.bf16.mxu0 %v1391_v40 }
 0x35b   : > { %vm1352_vm9 = vcmp.gt.f32.partialorder %v1322_v50, 0.0  ;;  %v1368_v54 = vmul.f32 0.01, %v1322_v50  ;;  %v1314_v55 = vadd.f32 %v3562_v10, %v1313_v52  ;;  %3138 = vmatmul.mubr.bf16.gmra.mxu0 %v1392_v51  ;;  %v1381_v63 = vsel %vm1349_vm10, %v1311_v44, %v1365_v53 }
 0x35c   : > { %v3115_v58 = vpop.f32.mrf.mxu1  ;;  %3186 = vmatpush3.bf16.msra.mxu0 %v3338_v24 }
 0x35d   : > { %vm1350_vm12 = vcmp.gt.f32.partialorder %v1314_v55, 0.0  ;;  %v1366_v59 = vmul.f32 0.01, %v1314_v55  ;;  %v1384_v61 = vsel %vm1352_vm9, %v1322_v50, %v1368_v54  ;;  %v1335_v1 = vadd.f32 %v3115_v58, %v3562_v10  ;;  %3187 = vmatprep.subr.bf16.mxu0 %v3339_v25 }
 0x35e   : > { %v1326_v60 = vpop.f32.mrf.mxu1  ;;  %v1394_v5 = vpack.c.bf16 %v1384_v61, %v1383_v3 }
 0x35f   : > { %v1327_v62 = vadd.f32 %v3562_v10, %v1326_v60  ;;  %v1382_v0 = vsel %vm1350_vm12, %v1314_v55, %v1366_v59  ;;  %v1371_v11 = vmul.f32 0.01, %v1335_v1  ;;  %vm1355_vm15 = vcmp.gt.f32.partialorder %v1335_v1, 0.0 }
 0x360   : > { %v3116_v57 = vpop.f32.mrf.mxu1  ;;  %v1393_v2 = vpack.c.bf16 %v1382_v0, %v1381_v63  ;;  %3188 = vmatpush3.bf16.msra.mxu0 %v3339_v25 }
 0x361   : > { %v1338_v4 = vadd.f32 %v3116_v57, %v3562_v10  ;;  %v1369_v7 = vmul.f32 0.01, %v1327_v62  ;;  %vm1353_vm14 = vcmp.gt.f32.partialorder %v1327_v62, 0.0  ;;  %v1387_v17 = vsel %vm1355_vm15, %v1335_v1, %v1371_v11  ;;  %3189 = vmatprep.subr.bf16.mxu0 %v3340_v26 }
 0x362   : > { %v1329_v6 = vpop.f32.mrf.mxu1  ;;  %3141 = vmatprep.mubr.bf16.mxu0 %v1393_v2 }
 0x363   : > { %vm1356_vm13 = vcmp.gt.f32.partialorder %v1338_v4, 0.0  ;;  %v1372_v8 = vmul.f32 0.01, %v1338_v4  ;;  %v1330_v9 = vadd.f32 %v3562_v10, %v1329_v6  ;;  %3142 = vmatmul.mubr.bf16.gmra.mxu0 %v1394_v5  ;;  %v1385_v14 = vsel %vm1353_vm14, %v1327_v62, %v1369_v7  ;;  %v3333_v10 = vld [vmem:[%s3438_s16 + $0x110] sm:$0xff]  }
 0x364   : > { %3159 = vmatprep.subr.bf16.mxu1 %v3333_v10  ;;  %3190 = vmatpush3.bf16.msra.mxu0 %v3340_v26 }
 0x365   : > { %vm1354_vm0 = vcmp.gt.f32.partialorder %v1330_v9, 0.0  ;;  %v1370_v12 = vmul.f32 0.01, %v1330_v9  ;;  %v1388_v13 = vsel %vm1356_vm13, %v1338_v4, %v1372_v8  ;;  %3160 = vmatpush3.bf16.msra.mxu1 %v3333_v10 }
 0x366   : > { %v1396_v18 = vpack.c.bf16 %v1388_v13, %v1387_v17  ;;  %3161 = vmatprep.subr.bf16.mxu1 %v3334_v19 }
 0x367   : > { %v1386_v15 = vsel %vm1354_vm0, %v1330_v9, %v1370_v12 }
 0x368   : > { %v1395_v16 = vpack.c.bf16 %v1386_v15, %v1385_v14 }
 0x369   : > { %3162 = vmatpush3.bf16.msra.mxu1 %v3334_v19 }
 0x36a   : > { %3145 = vmatprep.mubr.bf16.mxu0 %v1395_v16  ;;  %3163 = vmatprep.subr.bf16.mxu1 %v3335_v20 }
 0x36b   : > { %3146 = vmatmul.mubr.bf16.gmra.mxu0 %v1396_v18 }
 0x36d   : > { %3164 = vmatpush3.bf16.msra.mxu1 %v3335_v20 }
 0x413   : > { %v3135_v27 = vpop.f32.mrf.mxu0 }
 0x414   : > { %v1513_v31 = vadd.f32 %v3135_v27, %v3589_v28 }
 0x415   : > { %v1504_v29 = vpop.f32.mrf.mxu0 }
 0x416   : > { %v1505_v30 = vadd.f32 %v3589_v28, %v1504_v29  ;;  %v1585_v37 = vmul.f32 0.01, %v1513_v31  ;;  %vm1569_vm3 = vcmp.gt.f32.partialorder %v1513_v31, 0.0 }
 0x417   : > { %v3136_v23 = vpop.f32.mrf.mxu0 }
 0x418   : > { %v1516_v32 = vadd.f32 %v3136_v23, %v3589_v28  ;;  %v1583_v34 = vmul.f32 0.01, %v1505_v30  ;;  %vm1567_vm2 = vcmp.gt.f32.partialorder %v1505_v30, 0.0  ;;  %v1601_v46 = vsel %vm1569_vm3, %v1513_v31, %v1585_v37  ;;  %v3343_v37 = vld [vmem:[%s3438_s16 + $0x140] sm:$0xff]  }
 0x419   : > { %v1507_v33 = vpop.f32.mrf.mxu0 }
 0x41a   : > { %vm1570_vm1 = vcmp.gt.f32.partialorder %v1516_v32, 0.0  ;;  %v1586_v35 = vmul.f32 0.01, %v1516_v32  ;;  %v1508_v36 = vadd.f32 %v3589_v28, %v1507_v33  ;;  %v1599_v44 = vsel %vm1567_vm2, %v1505_v30, %v1583_v34 }
 0x41b   : > { %v3139_v38 = vpop.f32.mrf.mxu0 }
 0x41c   : > { %vm1568_vm4 = vcmp.gt.f32.partialorder %v1508_v36, 0.0  ;;  %v1584_v39 = vmul.f32 0.01, %v1508_v36  ;;  %v1602_v41 = vsel %vm1570_vm1, %v1516_v32, %v1586_v35  ;;  %v1529_v47 = vadd.f32 %v3139_v38, %v3589_v28  ;;  %v3344_v38 = vld [vmem:[%s3438_s16 + $0x1b8] sm:$0xff]  }
 0x41d   : > { %v1520_v42 = vpop.f32.mrf.mxu0  ;;  %v1616_v49 = vpack.c.bf16 %v1602_v41, %v1601_v46  ;;  %3213 = vmatprep.subr.bf16.mxu1 %v3344_v38  ;;  %v3346_v41 = vld [vmem:[%s3438_s16 + $0x1a8] sm:$0xff]  }
 0x41e   : > { %v1521_v43 = vadd.f32 %v3589_v28, %v1520_v42  ;;  %v1600_v45 = vsel %vm1568_vm4, %v1508_v36, %v1584_v39  ;;  %v1589_v55 = vmul.f32 0.01, %v1529_v47  ;;  %vm1573_vm7 = vcmp.gt.f32.partialorder %v1529_v47, 0.0  ;;  %v3342_v36 = vld [vmem:[%s3438_s16 + $0x148] sm:$0xff]   ;;  %v3345_v39 = vld [vmem:[%s3438_s16 + $0x1b0] sm:$0xff]   ;;  %v3347_v42 = vld [vmem:[%s3438_s16 + $0x1a0] sm:$0xff]  }
 0x41f   : > { %v3140_v48 = vpop.f32.mrf.mxu0  ;;  %v1615_v40 = vpack.c.bf16 %v1600_v45, %v1599_v44  ;;  %v3616_v45 = vld [vmem:[%s3505_s30 + $0x4] ss:$0 sm:$0xff] }
 0x420   : > { %v1532_v50 = vadd.f32 %v3140_v48, %v3589_v28  ;;  %v1587_v52 = vmul.f32 0.01, %v1521_v43  ;;  %vm1571_vm6 = vcmp.gt.f32.partialorder %v1521_v43, 0.0  ;;  %v1605_v2 = vsel %vm1573_vm7, %v1529_v47, %v1589_v55 }
 0x421   : > { %v1523_v51 = vpop.f32.mrf.mxu0  ;;  %3165 = vmatprep.mubr.bf16.mxu1 %v1615_v40 }
 0x422   : > { %vm1574_vm5 = vcmp.gt.f32.partialorder %v1532_v50, 0.0  ;;  %v1590_v53 = vmul.f32 0.01, %v1532_v50  ;;  %v1524_v54 = vadd.f32 %v3589_v28, %v1523_v51  ;;  %3166 = vmatmul.mubr.bf16.vlgmr.msra.gmra.mxu1 %v1616_v49  ;;  %v1603_v62 = vsel %vm1571_vm6, %v1521_v43, %v1587_v52  ;;  %v3348_v43 = vld [vmem:[%s3438_s16 + $0x198] sm:$0xff]  }
 0x423   : > { %v3143_v56 = vpop.f32.mrf.mxu0  ;;  %3214 = vmatpush3.bf16.msra.mxu1 %v3344_v38 }
 0x424   : > { %vm1572_vm8 = vcmp.gt.f32.partialorder %v1524_v54, 0.0  ;;  %v1588_v58 = vmul.f32 0.01, %v1524_v54  ;;  %v1606_v60 = vsel %vm1574_vm5, %v1532_v50, %v1590_v53  ;;  %v1545_v0 = vadd.f32 %v3143_v56, %v3589_v28  ;;  %3215 = vmatprep.subr.bf16.mxu1 %v3345_v39 }
 0x425   : > { %v1536_v59 = vpop.f32.mrf.mxu0  ;;  %v1618_v4 = vpack.c.bf16 %v1606_v60, %v1605_v2 }
 0x426   : > { %v1537_v61 = vadd.f32 %v3589_v28, %v1536_v59  ;;  %v1604_v63 = vsel %vm1572_vm8, %v1524_v54, %v1588_v58  ;;  %v1593_v9 = vmul.f32 0.01, %v1545_v0  ;;  %vm1577_vm11 = vcmp.gt.f32.partialorder %v1545_v0, 0.0 }
 0x427   : > { %v3144_v1 = vpop.f32.mrf.mxu0  ;;  %v1617_v57 = vpack.c.bf16 %v1604_v63, %v1603_v62  ;;  %3216 = vmatpush3.bf16.msra.mxu1 %v3345_v39 }
 0x428   : > { %v1548_v3 = vadd.f32 %v3144_v1, %v3589_v28  ;;  %v1591_v6 = vmul.f32 0.01, %v1537_v61  ;;  %vm1575_vm10 = vcmp.gt.f32.partialorder %v1537_v61, 0.0  ;;  %v1609_v20 = vsel %vm1577_vm11, %v1545_v0, %v1593_v9  ;;  %3217 = vmatprep.subr.bf16.mxu1 %v3346_v41 }
 0x429   : > { %v1539_v5 = vpop.f32.mrf.mxu0  ;;  %3169 = vmatprep.mubr.bf16.mxu1 %v1617_v57 }
 0x42a   : > { %vm1578_vm9 = vcmp.gt.f32.partialorder %v1548_v3, 0.0  ;;  %v1594_v7 = vmul.f32 0.01, %v1548_v3  ;;  %v1540_v8 = vadd.f32 %v3589_v28, %v1539_v5  ;;  %3170 = vmatmul.mubr.bf16.gmra.mxu1 %v1618_v4  ;;  %v1607_v16 = vsel %vm1575_vm10, %v1537_v61, %v1591_v6 }
 0x42b   : > { %v3147_v11 = vpop.f32.mrf.mxu0  ;;  %3218 = vmatpush3.bf16.msra.mxu1 %v3346_v41 }
 0x42c   : > { %vm1576_vm12 = vcmp.gt.f32.partialorder %v1540_v8, 0.0  ;;  %v1592_v12 = vmul.f32 0.01, %v1540_v8  ;;  %v1610_v14 = vsel %vm1578_vm9, %v1548_v3, %v1594_v7  ;;  %v1561_v18 = vadd.f32 %v3147_v11, %v3589_v28  ;;  %3219 = vmatprep.subr.bf16.mxu1 %v3347_v42 }
 0x42d   : > { %v1552_v13 = vpop.f32.mrf.mxu0  ;;  %v1620_v22 = vpack.c.bf16 %v1610_v14, %v1609_v20 }
 0x42e   : > { %v1553_v15 = vadd.f32 %v3589_v28, %v1552_v13  ;;  %v1608_v17 = vsel %vm1576_vm12, %v1540_v8, %v1592_v12  ;;  %v1597_v29 = vmul.f32 0.01, %v1561_v18  ;;  %vm1581_vm15 = vcmp.gt.f32.partialorder %v1561_v18, 0.0 }
 0x42f   : > { %v3148_v10 = vpop.f32.mrf.mxu0  ;;  %v1619_v19 = vpack.c.bf16 %v1608_v17, %v1607_v16  ;;  %3220 = vmatpush3.bf16.msra.mxu1 %v3347_v42 }
 0x430   : > { %v1564_v21 = vadd.f32 %v3148_v10, %v3589_v28  ;;  %v1595_v25 = vmul.f32 0.01, %v1553_v15  ;;  %vm1579_vm14 = vcmp.gt.f32.partialorder %v1553_v15, 0.0  ;;  %v1613_v34 = vsel %vm1581_vm15, %v1561_v18, %v1597_v29  ;;  %3221 = vmatprep.subr.bf16.mxu1 %v3348_v43 }
 0x431   : > { %v1555_v24 = vpop.f32.mrf.mxu0  ;;  %3173 = vmatprep.mubr.bf16.mxu1 %v1619_v19 }
 0x432   : > { %vm1582_vm13 = vcmp.gt.f32.partialorder %v1564_v21, 0.0  ;;  %v1598_v26 = vmul.f32 0.01, %v1564_v21  ;;  %v1556_v27 = vadd.f32 %v3589_v28, %v1555_v24  ;;  %3174 = vmatmul.mubr.bf16.gmra.mxu1 %v1620_v22  ;;  %v1611_v23 = vsel %vm1579_vm14, %v1553_v15, %v1595_v25  ;;  %v3341_v28 = vld [vmem:[%s3438_s16 + $0x150] sm:$0xff]  }
 0x433   : > { %3191 = vmatprep.subr.bf16.mxu0 %v3341_v28  ;;  %3222 = vmatpush3.bf16.msra.mxu1 %v3348_v43 }
 0x434   : > { %vm1580_vm0 = vcmp.gt.f32.partialorder %v1556_v27, 0.0  ;;  %v1596_v30 = vmul.f32 0.01, %v1556_v27  ;;  %v1614_v31 = vsel %vm1582_vm13, %v1564_v21, %v1598_v26  ;;  %3192 = vmatpush3.bf16.msra.mxu0 %v3341_v28 }
 0x435   : > { %v1622_v35 = vpack.c.bf16 %v1614_v31, %v1613_v34  ;;  %3193 = vmatprep.subr.bf16.mxu0 %v3342_v36 }
 0x436   : > { %v1612_v32 = vsel %vm1580_vm0, %v1556_v27, %v1596_v30 }
 0x437   : > { %v1621_v33 = vpack.c.bf16 %v1612_v32, %v1611_v23 }
 0x438   : > { %3194 = vmatpush3.bf16.msra.mxu0 %v3342_v36 }
 0x439   : > { %3177 = vmatprep.mubr.bf16.mxu1 %v1621_v33  ;;  %3195 = vmatprep.subr.bf16.mxu0 %v3343_v37 }
 0x43a   : > { %3178 = vmatmul.mubr.bf16.gmra.mxu1 %v1622_v35 }
 0x43c   : > { %3196 = vmatpush3.bf16.msra.mxu0 %v3343_v37 }
 0x4e2   : > { %v3167_v44 = vpop.f32.mrf.mxu1 }
 0x4e3   : > { %v1739_v48 = vadd.f32 %v3167_v44, %v3616_v45 }
 0x4e4   : > { %v1730_v46 = vpop.f32.mrf.mxu1 }
 0x4e5   : > { %v1731_v47 = vadd.f32 %v3616_v45, %v1730_v46  ;;  %v1811_v54 = vmul.f32 0.01, %v1739_v48  ;;  %vm1795_vm3 = vcmp.gt.f32.partialorder %v1739_v48, 0.0 }
 0x4e6   : > { %v3168_v40 = vpop.f32.mrf.mxu1 }
 0x4e7   : > { %v1742_v49 = vadd.f32 %v3168_v40, %v3616_v45  ;;  %v1809_v51 = vmul.f32 0.01, %v1731_v47  ;;  %vm1793_vm2 = vcmp.gt.f32.partialorder %v1731_v47, 0.0  ;;  %v1827_v63 = vsel %vm1795_vm3, %v1739_v48, %v1811_v54  ;;  %v3351_v54 = vld [vmem:[%s3438_s16 + $0x180] sm:$0xff]  }
 0x4e8   : > { %v1733_v50 = vpop.f32.mrf.mxu1 }
 0x4e9   : > { %vm1796_vm1 = vcmp.gt.f32.partialorder %v1742_v49, 0.0  ;;  %v1812_v52 = vmul.f32 0.01, %v1742_v49  ;;  %v1734_v53 = vadd.f32 %v3616_v45, %v1733_v50  ;;  %v1825_v61 = vsel %vm1793_vm2, %v1731_v47, %v1809_v51 }
 0x4ea   : > { %v3171_v55 = vpop.f32.mrf.mxu1 }
 0x4eb   : > { %vm1794_vm4 = vcmp.gt.f32.partialorder %v1734_v53, 0.0  ;;  %v1810_v56 = vmul.f32 0.01, %v1734_v53  ;;  %v1828_v58 = vsel %vm1796_vm1, %v1742_v49, %v1812_v52  ;;  %v1755_v0 = vadd.f32 %v3171_v55, %v3616_v45  ;;  %v3352_v55 = vld [vmem:[%s3461_s20 + $0x38] sm:$0xff]  }
 0x4ec   : > { %v1746_v59 = vpop.f32.mrf.mxu1  ;;  %v1842_v2 = vpack.c.bf16 %v1828_v58, %v1827_v63  ;;  %3245 = vmatprep.subr.bf16.mxu0 %v3352_v55  ;;  %v3354_v58 = vld [vmem:[%s3461_s20 + $0x28] sm:$0xff]  }
 0x4ed   : > { %v1747_v60 = vadd.f32 %v3616_v45, %v1746_v59  ;;  %v1826_v62 = vsel %vm1794_vm4, %v1734_v53, %v1810_v56  ;;  %v1815_v8 = vmul.f32 0.01, %v1755_v0  ;;  %vm1799_vm7 = vcmp.gt.f32.partialorder %v1755_v0, 0.0  ;;  %v3350_v53 = vld [vmem:[%s3438_s16 + $0x188] sm:$0xff]   ;;  %v3353_v56 = vld [vmem:[%s3461_s20 + $0x30] sm:$0xff]   ;;  %v3355_v59 = vld [vmem:[%s3461_s20 + $0x20] sm:$0xff]  }
 0x4ee   : > { %v3172_v1 = vpop.f32.mrf.mxu1  ;;  %v1841_v57 = vpack.c.bf16 %v1826_v62, %v1825_v61  ;;  %v3643_v62 = vld [vmem:[%s3505_s30 + $0x5] ss:$0 sm:$0xff] }
 0x4ef   : > { %v1758_v3 = vadd.f32 %v3172_v1, %v3616_v45  ;;  %v1813_v5 = vmul.f32 0.01, %v1747_v60  ;;  %vm1797_vm6 = vcmp.gt.f32.partialorder %v1747_v60, 0.0  ;;  %v1831_v19 = vsel %vm1799_vm7, %v1755_v0, %v1815_v8 }
 0x4f0   : > { %v1749_v4 = vpop.f32.mrf.mxu1  ;;  %3197 = vmatprep.mubr.bf16.mxu0 %v1841_v57 }
 0x4f1   : > { %vm1800_vm5 = vcmp.gt.f32.partialorder %v1758_v3, 0.0  ;;  %v1816_v6 = vmul.f32 0.01, %v1758_v3  ;;  %v1750_v7 = vadd.f32 %v3616_v45, %v1749_v4  ;;  %3198 = vmatmul.mubr.bf16.vlgmr.msra.gmra.mxu0 %v1842_v2  ;;  %v1829_v15 = vsel %vm1797_vm6, %v1747_v60, %v1813_v5  ;;  %v3356_v60 = vld [vmem:[%s3461_s20 + $0x18] sm:$0xff]  }
 0x4f2   : > { %v3175_v9 = vpop.f32.mrf.mxu1  ;;  %3246 = vmatpush3.bf16.msra.mxu0 %v3352_v55 }
 0x4f3   : > { %vm1798_vm8 = vcmp.gt.f32.partialorder %v1750_v7, 0.0  ;;  %v1814_v11 = vmul.f32 0.01, %v1750_v7  ;;  %v1832_v13 = vsel %vm1800_vm5, %v1758_v3, %v1816_v6  ;;  %v1771_v17 = vadd.f32 %v3175_v9, %v3616_v45  ;;  %3247 = vmatprep.subr.bf16.mxu0 %v3353_v56 }
 0x4f4   : > { %v1762_v12 = vpop.f32.mrf.mxu1  ;;  %v1844_v21 = vpack.c.bf16 %v1832_v13, %v1831_v19 }
 0x4f5   : > { %v1763_v14 = vadd.f32 %v3616_v45, %v1762_v12  ;;  %v1830_v16 = vsel %vm1798_vm8, %v1750_v7, %v1814_v11  ;;  %v1819_v27 = vmul.f32 0.01, %v1771_v17  ;;  %vm1803_vm11 = vcmp.gt.f32.partialorder %v1771_v17, 0.0 }
 0x4f6   : > { %v3176_v18 = vpop.f32.mrf.mxu1  ;;  %v1843_v10 = vpack.c.bf16 %v1830_v16, %v1829_v15  ;;  %3248 = vmatpush3.bf16.msra.mxu0 %v3353_v56 }
 0x4f7   : > { %v1774_v20 = vadd.f32 %v3176_v18, %v3616_v45  ;;  %v1817_v24 = vmul.f32 0.01, %v1763_v14  ;;  %vm1801_vm10 = vcmp.gt.f32.partialorder %v1763_v14, 0.0  ;;  %v1835_v37 = vsel %vm1803_vm11, %v1771_v17, %v1819_v27  ;;  %3249 = vmatprep.subr.bf16.mxu0 %v3354_v58 }
 0x4f8   : > { %v1765_v22 = vpop.f32.mrf.mxu1  ;;  %3201 = vmatprep.mubr.bf16.mxu0 %v1843_v10 }
 0x4f9   : > { %vm1804_vm9 = vcmp.gt.f32.partialorder %v1774_v20, 0.0  ;;  %v1820_v25 = vmul.f32 0.01, %v1774_v20  ;;  %v1766_v26 = vadd.f32 %v3616_v45, %v1765_v22  ;;  %3202 = vmatmul.mubr.bf16.gmra.mxu0 %v1844_v21  ;;  %v1833_v33 = vsel %vm1801_vm10, %v1763_v14, %v1817_v24 }
 0x4fa   : > { %v3179_v29 = vpop.f32.mrf.mxu1  ;;  %3250 = vmatpush3.bf16.msra.mxu0 %v3354_v58 }
 0x4fb   : > { %vm1802_vm12 = vcmp.gt.f32.partialorder %v1766_v26, 0.0  ;;  %v1818_v30 = vmul.f32 0.01, %v1766_v26  ;;  %v1836_v23 = vsel %vm1804_vm9, %v1774_v20, %v1820_v25  ;;  %v1787_v35 = vadd.f32 %v3179_v29, %v3616_v45  ;;  %3251 = vmatprep.subr.bf16.mxu0 %v3355_v59 }
 0x4fc   : > { %v1778_v31 = vpop.f32.mrf.mxu1  ;;  %v1846_v39 = vpack.c.bf16 %v1836_v23, %v1835_v37 }
 0x4fd   : > { %v1779_v32 = vadd.f32 %v3616_v45, %v1778_v31  ;;  %v1834_v34 = vsel %vm1802_vm12, %v1766_v26, %v1818_v30  ;;  %v1823_v46 = vmul.f32 0.01, %v1787_v35  ;;  %vm1807_vm15 = vcmp.gt.f32.partialorder %v1787_v35, 0.0 }
 0x4fe   : > { %v3180_v28 = vpop.f32.mrf.mxu1  ;;  %v1845_v36 = vpack.c.bf16 %v1834_v34, %v1833_v33  ;;  %3252 = vmatpush3.bf16.msra.mxu0 %v3355_v59 }
 0x4ff   : > { %v1790_v38 = vadd.f32 %v3180_v28, %v3616_v45  ;;  %v1821_v42 = vmul.f32 0.01, %v1779_v32  ;;  %vm1805_vm14 = vcmp.gt.f32.partialorder %v1779_v32, 0.0  ;;  %v1839_v51 = vsel %vm1807_vm15, %v1787_v35, %v1823_v46  ;;  %3253 = vmatprep.subr.bf16.mxu0 %v3356_v60 }
 0x500   : > { %v1781_v41 = vpop.f32.mrf.mxu1  ;;  %3205 = vmatprep.mubr.bf16.mxu0 %v1845_v36 }
 0x501   : > { %vm1808_vm13 = vcmp.gt.f32.partialorder %v1790_v38, 0.0  ;;  %v1824_v43 = vmul.f32 0.01, %v1790_v38  ;;  %v1782_v44 = vadd.f32 %v3616_v45, %v1781_v41  ;;  %3206 = vmatmul.mubr.bf16.gmra.mxu0 %v1846_v39  ;;  %v1837_v40 = vsel %vm1805_vm14, %v1779_v32, %v1821_v42  ;;  %v3349_v45 = vld [vmem:[%s3438_s16 + $0x190] sm:$0xff]  }
 0x502   : > { %3223 = vmatprep.subr.bf16.mxu1 %v3349_v45  ;;  %3254 = vmatpush3.bf16.msra.mxu0 %v3356_v60 }
 0x503   : > { %vm1806_vm0 = vcmp.gt.f32.partialorder %v1782_v44, 0.0  ;;  %v1822_v47 = vmul.f32 0.01, %v1782_v44  ;;  %v1840_v48 = vsel %vm1808_vm13, %v1790_v38, %v1824_v43  ;;  %3224 = vmatpush3.bf16.msra.mxu1 %v3349_v45 }
 0x504   : > { %v1848_v52 = vpack.c.bf16 %v1840_v48, %v1839_v51  ;;  %3225 = vmatprep.subr.bf16.mxu1 %v3350_v53 }
 0x505   : > { %v1838_v49 = vsel %vm1806_vm0, %v1782_v44, %v1822_v47 }
 0x506   : > { %v1847_v50 = vpack.c.bf16 %v1838_v49, %v1837_v40 }
 0x507   : > { %3226 = vmatpush3.bf16.msra.mxu1 %v3350_v53 }
 0x508   : > { %3209 = vmatprep.mubr.bf16.mxu0 %v1847_v50  ;;  %3227 = vmatprep.subr.bf16.mxu1 %v3351_v54 }
 0x509   : > { %3210 = vmatmul.mubr.bf16.gmra.mxu0 %v1848_v52 }
 0x50b   : > { %3228 = vmatpush3.bf16.msra.mxu1 %v3351_v54 }
 0x5b1   : > { %v3199_v61 = vpop.f32.mrf.mxu0 }
 0x5b2   : > { %v1965_v1 = vadd.f32 %v3199_v61, %v3643_v62 }
 0x5b3   : > { %v1956_v63 = vpop.f32.mrf.mxu0 }
 0x5b4   : > { %v1957_v0 = vadd.f32 %v3643_v62, %v1956_v63  ;;  %v2037_v7 = vmul.f32 0.01, %v1965_v1  ;;  %vm2021_vm3 = vcmp.gt.f32.partialorder %v1965_v1, 0.0 }
 0x5b5   : > { %v3200_v57 = vpop.f32.mrf.mxu0 }
 0x5b6   : > { %v1968_v2 = vadd.f32 %v3200_v57, %v3643_v62  ;;  %v2035_v4 = vmul.f32 0.01, %v1957_v0  ;;  %vm2019_vm2 = vcmp.gt.f32.partialorder %v1957_v0, 0.0  ;;  %v2053_v16 = vsel %vm2021_vm3, %v1965_v1, %v2037_v7  ;;  %v3359_v7 = vld [vmem:[%s3461_s20] sm:$0xff]  }
 0x5b7   : > { %v1959_v3 = vpop.f32.mrf.mxu0 }
 0x5b8   : > { %vm2022_vm1 = vcmp.gt.f32.partialorder %v1968_v2, 0.0  ;;  %v2038_v5 = vmul.f32 0.01, %v1968_v2  ;;  %v1960_v6 = vadd.f32 %v3643_v62, %v1959_v3  ;;  %v2051_v14 = vsel %vm2019_vm2, %v1957_v0, %v2035_v4 }
 0x5b9   : > { %v3203_v8 = vpop.f32.mrf.mxu0 }
 0x5ba   : > { %vm2020_vm4 = vcmp.gt.f32.partialorder %v1960_v6, 0.0  ;;  %v2036_v9 = vmul.f32 0.01, %v1960_v6  ;;  %v2054_v11 = vsel %vm2022_vm1, %v1968_v2, %v2038_v5  ;;  %v1981_v17 = vadd.f32 %v3203_v8, %v3643_v62 }
 0x5bb   : > { %v1972_v12 = vpop.f32.mrf.mxu0  ;;  %v2068_v19 = vpack.c.bf16 %v2054_v11, %v2053_v16 }
 0x5bc   : > { %v1973_v13 = vadd.f32 %v3643_v62, %v1972_v12  ;;  %v2052_v15 = vsel %vm2020_vm4, %v1960_v6, %v2036_v9  ;;  %v2041_v26 = vmul.f32 0.01, %v1981_v17  ;;  %vm2025_vm7 = vcmp.gt.f32.partialorder %v1981_v17, 0.0  ;;  %v3357_v6 = vld [vmem:[%s3461_s20 + $0x10] sm:$0xff]   ;;  %v3665_v9 = vld [vmem:[%s3505_s30 + $0x6] ss:$0 sm:$0xff] }
 0x5bd   : > { %v3204_v18 = vpop.f32.mrf.mxu0  ;;  %v2067_v10 = vpack.c.bf16 %v2052_v15, %v2051_v14  ;;  %3255 = vmatprep.subr.bf16.mxu0 %v3357_v6 }
 0x5be   : > { %v1984_v20 = vadd.f32 %v3204_v18, %v3643_v62  ;;  %v2039_v22 = vmul.f32 0.01, %v1973_v13  ;;  %vm2023_vm6 = vcmp.gt.f32.partialorder %v1973_v13, 0.0  ;;  %v2057_v36 = vsel %vm2025_vm7, %v1981_v17, %v2041_v26  ;;  %3256 = vmatpush3.bf16.msra.mxu0 %v3357_v6 }
 0x5bf   : > { %v1975_v21 = vpop.f32.mrf.mxu0  ;;  %3229 = vmatprep.mubr.bf16.mxu1 %v2067_v10 }
 0x5c0   : > { %vm2026_vm5 = vcmp.gt.f32.partialorder %v1984_v20, 0.0  ;;  %v2042_v24 = vmul.f32 0.01, %v1984_v20  ;;  %v1976_v25 = vadd.f32 %v3643_v62, %v1975_v21  ;;  %3230 = vmatmul.mubr.bf16.vlgmr.msra.gmra.mxu1 %v2068_v19  ;;  %v2055_v32 = vsel %vm2023_vm6, %v1973_v13, %v2039_v22 }
 0x5c1   : > { %v3207_v27 = vpop.f32.mrf.mxu0 }
 0x5c2   : > { %vm2024_vm8 = vcmp.gt.f32.partialorder %v1976_v25, 0.0  ;;  %v2040_v29 = vmul.f32 0.01, %v1976_v25  ;;  %v2058_v31 = vsel %vm2026_vm5, %v1984_v20, %v2042_v24  ;;  %v1997_v34 = vadd.f32 %v3207_v27, %v3643_v62 }
 0x5c3   : > { %v1988_v30 = vpop.f32.mrf.mxu0  ;;  %v2070_v38 = vpack.c.bf16 %v2058_v31, %v2057_v36 }
 0x5c4   : > { %v1989_v23 = vadd.f32 %v3643_v62, %v1988_v30  ;;  %v2056_v33 = vsel %vm2024_vm8, %v1976_v25, %v2040_v29  ;;  %v2045_v44 = vmul.f32 0.01, %v1997_v34  ;;  %vm2029_vm11 = vcmp.gt.f32.partialorder %v1997_v34, 0.0 }
 0x5c5   : > { %v3208_v35 = vpop.f32.mrf.mxu0  ;;  %v2069_v28 = vpack.c.bf16 %v2056_v33, %v2055_v32 }
 0x5c6   : > { %v2000_v37 = vadd.f32 %v3208_v35, %v3643_v62  ;;  %v2043_v41 = vmul.f32 0.01, %v1989_v23  ;;  %vm2027_vm10 = vcmp.gt.f32.partialorder %v1989_v23, 0.0  ;;  %v2061_v54 = vsel %vm2029_vm11, %v1997_v34, %v2045_v44 }
 0x5c7   : > { %v1991_v39 = vpop.f32.mrf.mxu0  ;;  %3233 = vmatprep.mubr.bf16.mxu1 %v2069_v28 }
 0x5c8   : > { %vm2030_vm9 = vcmp.gt.f32.partialorder %v2000_v37, 0.0  ;;  %v2046_v42 = vmul.f32 0.01, %v2000_v37  ;;  %v1992_v43 = vadd.f32 %v3643_v62, %v1991_v39  ;;  %3234 = vmatmul.mubr.bf16.gmra.mxu1 %v2070_v38  ;;  %v2059_v50 = vsel %vm2027_vm10, %v1989_v23, %v2043_v41 }
 0x5c9   : > { %v3211_v46 = vpop.f32.mrf.mxu0 }
 0x5ca   : > { %vm2028_vm12 = vcmp.gt.f32.partialorder %v1992_v43, 0.0  ;;  %v2044_v47 = vmul.f32 0.01, %v1992_v43  ;;  %v2062_v40 = vsel %vm2030_vm9, %v2000_v37, %v2046_v42  ;;  %v2013_v52 = vadd.f32 %v3211_v46, %v3643_v62 }
 0x5cb   : > { %v2004_v48 = vpop.f32.mrf.mxu0  ;;  %v2072_v56 = vpack.c.bf16 %v2062_v40, %v2061_v54 }
 0x5cc   : > { %v2005_v49 = vadd.f32 %v3643_v62, %v2004_v48  ;;  %v2060_v51 = vsel %vm2028_vm12, %v1992_v43, %v2044_v47  ;;  %v2049_v63 = vmul.f32 0.01, %v2013_v52  ;;  %vm2033_vm15 = vcmp.gt.f32.partialorder %v2013_v52, 0.0 }
 0x5cd   : > { %v3212_v45 = vpop.f32.mrf.mxu0  ;;  %v2071_v53 = vpack.c.bf16 %v2060_v51, %v2059_v50 }
 0x5ce   : > { %v2016_v55 = vadd.f32 %v3212_v45, %v3643_v62  ;;  %v2047_v59 = vmul.f32 0.01, %v2005_v49  ;;  %vm2031_vm14 = vcmp.gt.f32.partialorder %v2005_v49, 0.0  ;;  %v2065_v4 = vsel %vm2033_vm15, %v2013_v52, %v2049_v63 }
 0x5cf   : > { %v2007_v58 = vpop.f32.mrf.mxu0  ;;  %3237 = vmatprep.mubr.bf16.mxu1 %v2071_v53 }
 0x5d0   : > { %vm2034_vm13 = vcmp.gt.f32.partialorder %v2016_v55, 0.0  ;;  %v2050_v60 = vmul.f32 0.01, %v2016_v55  ;;  %v2008_v61 = vadd.f32 %v3643_v62, %v2007_v58  ;;  %3238 = vmatmul.mubr.bf16.gmra.mxu1 %v2072_v56  ;;  %v2063_v57 = vsel %vm2031_vm14, %v2005_v49, %v2047_v59  ;;  %v3358_v62 = vld [vmem:[%s3461_s20 + $0x8] sm:$0xff]  }
 0x5d1   : > { %3257 = vmatprep.subr.bf16.mxu0 %v3358_v62 }
 0x5d2   : > { %vm2032_vm0 = vcmp.gt.f32.partialorder %v2008_v61, 0.0  ;;  %v2048_v0 = vmul.f32 0.01, %v2008_v61  ;;  %v2066_v1 = vsel %vm2034_vm13, %v2016_v55, %v2050_v60  ;;  %3258 = vmatpush3.bf16.msra.mxu0 %v3358_v62 }
 0x5d3   : > { %v2074_v5 = vpack.c.bf16 %v2066_v1, %v2065_v4  ;;  %3259 = vmatprep.subr.bf16.mxu0 %v3359_v7 }
 0x5d4   : > { %v2064_v2 = vsel %vm2032_vm0, %v2008_v61, %v2048_v0 }
 0x5d5   : > { %v2073_v3 = vpack.c.bf16 %v2064_v2, %v2063_v57 }
 0x5d6   : > { %3260 = vmatpush3.bf16.msra.mxu0 %v3359_v7 }
 0x5d7   : > { %3241 = vmatprep.mubr.bf16.mxu1 %v2073_v3 }
 0x5d8   : > { %3242 = vmatmul.mubr.bf16.gmra.mxu1 %v2074_v5 }
 0x680   : > { %v3231_v8 = vpop.f32.mrf.mxu1 }
 0x681   : > { %v2191_v13 = vadd.f32 %v3231_v8, %v3665_v9 }
 0x682   : > { %v2182_v11 = vpop.f32.mrf.mxu1 }
 0x683   : > { %v2183_v12 = vadd.f32 %v3665_v9, %v2182_v11  ;;  %v2263_v19 = vmul.f32 0.01, %v2191_v13  ;;  %vm2247_vm3 = vcmp.gt.f32.partialorder %v2191_v13, 0.0 }
 0x684   : > { %v3232_v14 = vpop.f32.mrf.mxu1 }
 0x685   : > { %v2194_v15 = vadd.f32 %v3232_v14, %v3665_v9  ;;  %v2261_v17 = vmul.f32 0.01, %v2183_v12  ;;  %vm2245_vm2 = vcmp.gt.f32.partialorder %v2183_v12, 0.0  ;;  %v2279_v29 = vsel %vm2247_vm3, %v2191_v13, %v2263_v19 }
 0x686   : > { %v2185_v16 = vpop.f32.mrf.mxu1 }
 0x687   : > { %vm2248_vm1 = vcmp.gt.f32.partialorder %v2194_v15, 0.0  ;;  %v2264_v18 = vmul.f32 0.01, %v2194_v15  ;;  %v2186_v10 = vadd.f32 %v3665_v9, %v2185_v16  ;;  %v2277_v26 = vsel %vm2245_vm2, %v2183_v12, %v2261_v17 }
 0x688   : > { %v3235_v20 = vpop.f32.mrf.mxu1  ;;  %vm2517_vm2 = vcmask 31744  }
 0x689   : > { %vm2246_vm4 = vcmp.gt.f32.partialorder %v2186_v10, 0.0  ;;  %v2262_v21 = vmul.f32 0.01, %v2186_v10  ;;  %v2280_v22 = vsel %vm2248_vm1, %v2194_v15, %v2264_v18  ;;  %v2207_v30 = vadd.f32 %v3235_v20, %v3665_v9 }
 0x68a   : > { %v2198_v24 = vpop.f32.mrf.mxu1  ;;  %v2294_v32 = vpack.c.bf16 %v2280_v22, %v2279_v29 }
 0x68b   : > { %v2199_v25 = vadd.f32 %v3665_v9, %v2198_v24  ;;  %v2278_v27 = vsel %vm2246_vm4, %v2186_v10, %v2262_v21  ;;  %v2267_v37 = vmul.f32 0.01, %v2207_v30  ;;  %vm2251_vm7 = vcmp.gt.f32.partialorder %v2207_v30, 0.0 }
 0x68c   : > { %v3236_v31 = vpop.f32.mrf.mxu1  ;;  %v2293_v23 = vpack.c.bf16 %v2278_v27, %v2277_v26 }
 0x68d   : > { %v2210_v33 = vadd.f32 %v3236_v31, %v3665_v9  ;;  %v2265_v35 = vmul.f32 0.01, %v2199_v25  ;;  %vm2249_vm6 = vcmp.gt.f32.partialorder %v2199_v25, 0.0  ;;  %v2283_v49 = vsel %vm2251_vm7, %v2207_v30, %v2267_v37 }
 0x68e   : > { %v2201_v34 = vpop.f32.mrf.mxu1  ;;  %3261 = vmatprep.mubr.bf16.mxu0 %v2293_v23 }
 0x68f   : > { %vm2252_vm5 = vcmp.gt.f32.partialorder %v2210_v33, 0.0  ;;  %v2268_v28 = vmul.f32 0.01, %v2210_v33  ;;  %v2202_v36 = vadd.f32 %v3665_v9, %v2201_v34  ;;  %3262 = vmatmul.mubr.bf16.vlgmr.msra.gmra.mxu0 %v2294_v32  ;;  %v2281_v44 = vsel %vm2249_vm6, %v2199_v25, %v2265_v35 }
 0x690   : > { %v3239_v38 = vpop.f32.mrf.mxu1 }
 0x691   : > { %vm2250_vm8 = vcmp.gt.f32.partialorder %v2202_v36, 0.0  ;;  %v2266_v39 = vmul.f32 0.01, %v2202_v36  ;;  %v2284_v42 = vsel %vm2252_vm5, %v2210_v33, %v2268_v28  ;;  %v2223_v47 = vadd.f32 %v3239_v38, %v3665_v9 }
 0x692   : > { %v2214_v41 = vpop.f32.mrf.mxu1  ;;  %v2296_v51 = vpack.c.bf16 %v2284_v42, %v2283_v49 }
 0x693   : > { %v2215_v43 = vadd.f32 %v3665_v9, %v2214_v41  ;;  %v2282_v46 = vsel %vm2250_vm8, %v2202_v36, %v2266_v39  ;;  %v2271_v55 = vmul.f32 0.01, %v2223_v47  ;;  %vm2255_vm11 = vcmp.gt.f32.partialorder %v2223_v47, 0.0 }
 0x694   : > { %v3240_v48 = vpop.f32.mrf.mxu1  ;;  %v2295_v40 = vpack.c.bf16 %v2282_v46, %v2281_v44 }
 0x695   : > { %v2226_v50 = vadd.f32 %v3240_v48, %v3665_v9  ;;  %v2269_v45 = vmul.f32 0.01, %v2215_v43  ;;  %vm2253_vm10 = vcmp.gt.f32.partialorder %v2215_v43, 0.0  ;;  %v2287_v3 = vsel %vm2255_vm11, %v2223_v47, %v2271_v55 }
 0x696   : > { %v2217_v52 = vpop.f32.mrf.mxu1  ;;  %3265 = vmatprep.mubr.bf16.mxu0 %v2295_v40 }
 0x697   : > { %vm2256_vm9 = vcmp.gt.f32.partialorder %v2226_v50, 0.0  ;;  %v2272_v53 = vmul.f32 0.01, %v2226_v50  ;;  %v2218_v54 = vadd.f32 %v3665_v9, %v2217_v52  ;;  %3266 = vmatmul.mubr.bf16.gmra.mxu0 %v2296_v51  ;;  %v2285_v63 = vsel %vm2253_vm10, %v2215_v43, %v2269_v45 }
 0x698   : > { %v3243_v56 = vpop.f32.mrf.mxu1 }
 0x699   : > { %vm2254_vm12 = vcmp.gt.f32.partialorder %v2218_v54, 0.0  ;;  %v2270_v58 = vmul.f32 0.01, %v2218_v54  ;;  %v2288_v60 = vsel %vm2256_vm9, %v2226_v50, %v2272_v53  ;;  %v2239_v1 = vadd.f32 %v3243_v56, %v3665_v9 }
 0x69a   : > { %v2230_v59 = vpop.f32.mrf.mxu1  ;;  %v2298_v5 = vpack.c.bf16 %v2288_v60, %v2287_v3 }
 0x69b   : > { %v2231_v61 = vadd.f32 %v3665_v9, %v2230_v59  ;;  %v2286_v0 = vsel %vm2254_vm12, %v2218_v54, %v2270_v58  ;;  %v2275_v11 = vmul.f32 0.01, %v2239_v1  ;;  %vm2259_vm15 = vcmp.gt.f32.partialorder %v2239_v1, 0.0 }
 0x69c   : > { %v3244_v57 = vpop.f32.mrf.mxu1  ;;  %v2297_v2 = vpack.c.bf16 %v2286_v0, %v2285_v63 }
 0x69d   : > { %v2242_v4 = vadd.f32 %v3244_v57, %v3665_v9  ;;  %v2273_v62 = vmul.f32 0.01, %v2231_v61  ;;  %vm2257_vm14 = vcmp.gt.f32.partialorder %v2231_v61, 0.0  ;;  %v2291_v17 = vsel %vm2259_vm15, %v2239_v1, %v2275_v11 }
 0x69e   : > { %v2233_v6 = vpop.f32.mrf.mxu1  ;;  %3269 = vmatprep.mubr.bf16.mxu0 %v2297_v2 }
 0x69f   : > { %vm2260_vm13 = vcmp.gt.f32.partialorder %v2242_v4, 0.0  ;;  %v2276_v7 = vmul.f32 0.01, %v2242_v4  ;;  %v2234_v8 = vadd.f32 %v3665_v9, %v2233_v6  ;;  %3270 = vmatmul.mubr.bf16.gmra.mxu0 %v2298_v5  ;;  %v2289_v14 = vsel %vm2257_vm14, %v2231_v61, %v2273_v62  ;;  %v3687_v9 = vld [vmem:[%s462_s10] ss:$0 sm:$0xff] }
 0x6a1   : > { %vm2258_vm0 = vcmp.gt.f32.partialorder %v2234_v8, 0.0  ;;  %v2274_v12 = vmul.f32 0.01, %v2234_v8  ;;  %v2292_v13 = vsel %vm2260_vm13, %v2242_v4, %v2276_v7 }
 0x6a2   : > { %v2300_v18 = vpack.c.bf16 %v2292_v13, %v2291_v17 }
 0x6a3   : > { %v2290_v15 = vsel %vm2258_vm0, %v2234_v8, %v2274_v12 }
 0x6a4   : > { %v2299_v16 = vpack.c.bf16 %v2290_v15, %v2289_v14 }
 0x6a6   : > { %3273 = vmatprep.mubr.bf16.mxu0 %v2299_v16 }
 0x6a7   : > { %3274 = vmatmul.mubr.bf16.gmra.mxu0 %v2300_v18 }
 0x74f   : > { %v3263_v10 = vpop.f32.mrf.mxu0 }
 0x750   : > { %v2415_v19 = vadd.f32 %v3263_v10, %v3687_v9 }
 0x751   : > { %v2406_v20 = vpop.f32.mrf.mxu0 }
 0x752   : > { %vm2471_vm1 = vcmp.gt.f32.partialorder %v2415_v19, 0.0  ;;  %v2487_v21 = vmul.f32 0.01, %v2415_v19  ;;  %v2407_v22 = vadd.f32 %v3687_v9, %v2406_v20 }
 0x753   : > { %v3264_v24 = vpop.f32.mrf.mxu0 }
 0x754   : > { %v2503_v25 = vsel %vm2471_vm1, %v2415_v19, %v2487_v21  ;;  %vm2469_vm3 = vcmp.gt.f32.partialorder %v2407_v22, 0.0  ;;  %v2485_v26 = vmul.f32 0.01, %v2407_v22  ;;  %v2418_v27 = vadd.f32 %v3264_v24, %v3687_v9 }
 0x755   : > { %2520 = vst.msk [vmem:[%s3694_s14 + $0x10] sm:$0xff] %vm2517_vm2, %v2503_v25  ;;  %v2409_v29 = vpop.f32.mrf.mxu0 }
 0x756   : > { %v2501_v30 = vsel %vm2469_vm3, %v2407_v22, %v2485_v26  ;;  %vm2472_vm4 = vcmp.gt.f32.partialorder %v2418_v27, 0.0  ;;  %v2488_v31 = vmul.f32 0.01, %v2418_v27  ;;  %v2410_v23 = vadd.f32 %v3687_v9, %v2409_v29 }
 0x757   : > { %2518 = vst.msk [vmem:[%s3694_s14] sm:$0xff] %vm2517_vm2, %v2501_v30  ;;  %v3267_v32 = vpop.f32.mrf.mxu0 }
 0x758   : > { %v2504_v33 = vsel %vm2472_vm4, %v2418_v27, %v2488_v31  ;;  %vm2470_vm5 = vcmp.gt.f32.partialorder %v2410_v23, 0.0  ;;  %v2486_v34 = vmul.f32 0.01, %v2410_v23  ;;  %v2431_v35 = vadd.f32 %v3267_v32, %v3687_v9 }
 0x759   : > { %2521 = vst.msk [vmem:[%s3694_s14 + $0x18] sm:$0xff] %vm2517_vm2, %v2504_v33  ;;  %v2422_v28 = vpop.f32.mrf.mxu0 }
 0x75a   : > { %v2502_v36 = vsel %vm2470_vm5, %v2410_v23, %v2486_v34  ;;  %vm2475_vm6 = vcmp.gt.f32.partialorder %v2431_v35, 0.0  ;;  %v2491_v37 = vmul.f32 0.01, %v2431_v35  ;;  %v2423_v38 = vadd.f32 %v3687_v9, %v2422_v28 }
 0x75b   : > { %2519 = vst.msk [vmem:[%s3694_s14 + $0x8] sm:$0xff] %vm2517_vm2, %v2502_v36  ;;  %v3268_v39 = vpop.f32.mrf.mxu0 }
 0x75c   : > { %v2507_v41 = vsel %vm2475_vm6, %v2431_v35, %v2491_v37  ;;  %vm2473_vm7 = vcmp.gt.f32.partialorder %v2423_v38, 0.0  ;;  %v2489_v42 = vmul.f32 0.01, %v2423_v38  ;;  %v2434_v43 = vadd.f32 %v3268_v39, %v3687_v9 }
 0x75d   : > { %2524 = vst.msk [vmem:[%s3694_s14 + $0x30] sm:$0xff] %vm2517_vm2, %v2507_v41  ;;  %v2425_v44 = vpop.f32.mrf.mxu0 }
 0x75e   : > { %v2505_v46 = vsel %vm2473_vm7, %v2423_v38, %v2489_v42  ;;  %vm2476_vm8 = vcmp.gt.f32.partialorder %v2434_v43, 0.0  ;;  %v2492_v47 = vmul.f32 0.01, %v2434_v43  ;;  %v2426_v48 = vadd.f32 %v3687_v9, %v2425_v44 }
 0x75f   : > { %2522 = vst.msk [vmem:[%s3694_s14 + $0x20] sm:$0xff] %vm2517_vm2, %v2505_v46  ;;  %v3271_v40 = vpop.f32.mrf.mxu0 }
 0x760   : > { %v2508_v49 = vsel %vm2476_vm8, %v2434_v43, %v2492_v47  ;;  %vm2474_vm9 = vcmp.gt.f32.partialorder %v2426_v48, 0.0  ;;  %v2490_v50 = vmul.f32 0.01, %v2426_v48  ;;  %v2447_v51 = vadd.f32 %v3271_v40, %v3687_v9 }
 0x761   : > { %2525 = vst.msk [vmem:[%s3694_s14 + $0x38] sm:$0xff] %vm2517_vm2, %v2508_v49  ;;  %v2438_v52 = vpop.f32.mrf.mxu0 }
 0x762   : > { %v2506_v45 = vsel %vm2474_vm9, %v2426_v48, %v2490_v50  ;;  %vm2479_vm10 = vcmp.gt.f32.partialorder %v2447_v51, 0.0  ;;  %v2495_v53 = vmul.f32 0.01, %v2447_v51  ;;  %v2439_v54 = vadd.f32 %v3687_v9, %v2438_v52 }
 0x763   : > { %2523 = vst.msk [vmem:[%s3694_s14 + $0x28] sm:$0xff] %vm2517_vm2, %v2506_v45  ;;  %v3272_v55 = vpop.f32.mrf.mxu0 }
 0x764   : > { %v2511_v56 = vsel %vm2479_vm10, %v2447_v51, %v2495_v53  ;;  %vm2477_vm11 = vcmp.gt.f32.partialorder %v2439_v54, 0.0  ;;  %v2493_v58 = vmul.f32 0.01, %v2439_v54  ;;  %v2450_v59 = vadd.f32 %v3272_v55, %v3687_v9 }
 0x765   : > { %2528 = vst.msk [vmem:[%s3694_s14 + $0x50] sm:$0xff] %vm2517_vm2, %v2511_v56  ;;  %v2441_v60 = vpop.f32.mrf.mxu0 }
 0x766   : > { %v2509_v61 = vsel %vm2477_vm11, %v2439_v54, %v2493_v58  ;;  %vm2480_vm12 = vcmp.gt.f32.partialorder %v2450_v59, 0.0  ;;  %v2496_v63 = vmul.f32 0.01, %v2450_v59  ;;  %v2442_v0 = vadd.f32 %v3687_v9, %v2441_v60 }
 0x767   : > { %2526 = vst.msk [vmem:[%s3694_s14 + $0x40] sm:$0xff] %vm2517_vm2, %v2509_v61  ;;  %v3275_v1 = vpop.f32.mrf.mxu0 }
 0x768   : > { %v2512_v57 = vsel %vm2480_vm12, %v2450_v59, %v2496_v63  ;;  %vm2478_vm13 = vcmp.gt.f32.partialorder %v2442_v0, 0.0  ;;  %v2494_v2 = vmul.f32 0.01, %v2442_v0  ;;  %v2463_v3 = vadd.f32 %v3275_v1, %v3687_v9 }
 0x769   : > { %2529 = vst.msk [vmem:[%s3694_s14 + $0x58] sm:$0xff] %vm2517_vm2, %v2512_v57  ;;  %v2454_v4 = vpop.f32.mrf.mxu0 }
 0x76a   : > { %v2510_v5 = vsel %vm2478_vm13, %v2442_v0, %v2494_v2  ;;  %vm2483_vm14 = vcmp.gt.f32.partialorder %v2463_v3, 0.0  ;;  %v2499_v6 = vmul.f32 0.01, %v2463_v3  ;;  %v2455_v62 = vadd.f32 %v3687_v9, %v2454_v4 }
 0x76b   : > { %2527 = vst.msk [vmem:[%s3694_s14 + $0x48] sm:$0xff] %vm2517_vm2, %v2510_v5  ;;  %v3276_v7 = vpop.f32.mrf.mxu0 }
 0x76c   : > { %v2515_v8 = vsel %vm2483_vm14, %v2463_v3, %v2499_v6  ;;  %vm2481_vm15 = vcmp.gt.f32.partialorder %v2455_v62, 0.0  ;;  %v2497_v11 = vmul.f32 0.01, %v2455_v62  ;;  %v2466_v12 = vadd.f32 %v3276_v7, %v3687_v9 }
 0x76d   : > { %2532 = vst.msk [vmem:[%s3694_s14 + $0x70] sm:$0xff] %vm2517_vm2, %v2515_v8  ;;  %v2457_v13 = vpop.f32.mrf.mxu0 }
 0x76e   : > { %v2513_v14 = vsel %vm2481_vm15, %v2455_v62, %v2497_v11  ;;  %vm2484_vm0 = vcmp.gt.f32.partialorder %v2466_v12, 0.0  ;;  %v2500_v15 = vmul.f32 0.01, %v2466_v12  ;;  %v2458_v16 = vadd.f32 %v3687_v9, %v2457_v13 }
 0x76f   : > { %2530 = vst.msk [vmem:[%s3694_s14 + $0x60] sm:$0xff] %vm2517_vm2, %v2513_v14 }
 0x770   : > { %v2516_v17 = vsel %vm2484_vm0, %v2466_v12, %v2500_v15  ;;  %vm2482_vm1 = vcmp.gt.f32.partialorder %v2458_v16, 0.0  ;;  %v2498_v18 = vmul.f32 0.01, %v2458_v16 }
 0x771   : > { %2533 = vst.msk [vmem:[%s3694_s14 + $0x78] sm:$0xff] %vm2517_vm2, %v2516_v17 }
 0x772   : > { %v2514_v10 = vsel %vm2482_vm1, %v2458_v16, %v2498_v18 }
 0x773   : > { %2531 = vst.msk [vmem:[%s3694_s14 + $0x68] sm:$0xff] %vm2517_vm2, %v2514_v10 }
 0x774 PF: > { %s17_s24 = sadd.s32 1, %s3366_s24  }
 0x775   : > { %p14_p6 = scmp.ge.s32.totalorder %s17_s24, 4  }
 0x777   :  { %16 = sbr.rel (!%p14_p6) target bundleno = 1 (0x1), region = 108 }

</bundles_post_ra>
